<compile_context>
chip_gen: v7x
topology: tpu7x:2x2x1
jax: 0.10.0
libtpu: 0.0.40
codegen_flags: <defaults>
</compile_context>

<pallas_src>
import functools
import math

import jax
import jax.numpy as jnp
from jax.experimental import pallas as pl
from jax.experimental.pallas import tpu as pltpu


def _round_up(n, m):
    return -(-n // m) * m


def _block_bytes(H, W, tt, K):
    """VMEM bytes for one grid step: input + output blocks (double-buffered by
    the Pallas pipeline) plus the padded scratch, using internal (8,128)-padded
    tile sizes (not raw element counts)."""
    p = (K - 1) // 2
    lanes = _round_up(tt, 128)
    io = H * _round_up(W, 8) * lanes * 4
    pad = (H + 2 * p) * _round_up(W + 2 * p, 8) * lanes * 4
    return 2 * io + 2 * io + pad


def _plan_tiling(H, W, T, K):
    """Pick the frame-chunk size Tt (lane dim of the block) and a vmem limit."""
    try:
        info = pltpu.get_tpu_info()
        vmem_cap = int(getattr(info, "vmem_capacity_bytes", 64 * 1024 * 1024))
    except Exception:  # hardware query unavailable: assume the small part
        vmem_cap = 64 * 1024 * 1024
    if vmem_cap >= 128 * 1024 * 1024:        # v5e / v6e: 128 MiB physical VMEM
        budget, vmem_limit = 22 * 1024 * 1024, 64 * 1024 * 1024
    else:                                    # v7x: 64 MiB physical VMEM
        budget, vmem_limit = 10 * 1024 * 1024, 32 * 1024 * 1024

    # The last block dim must be a multiple of 128 or the full dim.
    if T <= 128:
        tt = T                               # single chunk (tiny problems)
    else:
        cands = [m * 128 for m in range(1, T // 128 + 1)
                 if _block_bytes(H, W, m * 128, K) <= budget]
        if not cands:
            cands = [128]                    # smallest legal chunk
        # Prefer: exact divisors of T (no masked tail block), then >=2 grid
        # steps (v7x megacore), then the largest chunk (fewest grid steps).
        tt = max(cands, key=lambda c: (T % c == 0, pl.cdiv(T, c) >= 2, c))

    need = _block_bytes(H, W, tt, K)
    if need > vmem_cap:
        # TODO(synk): add a spatial (H) grid axis with halo handling for frames
        # too large to fit even a single minimal frame-chunk block in VMEM.
        raise NotImplementedError(
            f"frame {H}x{W} needs {need} B VMEM > capacity {vmem_cap} B")
    if need > vmem_limit:
        vmem_limit = min(vmem_cap, need + (4 << 20))
    return tt, vmem_limit


def _conv3dc_stencil_kernel(x_ref, w_ref, b_ref, o_ref, pad_ref, *, K, H, W):
    """'same' K*K stencil on one chunk of frames, natural (H, W, T) layout.

    x_ref:   (H, W, Tt) input block (VMEM).
    w_ref:   (K*K,) conv taps (SMEM).      b_ref: (1,) bias (SMEM).
    o_ref:   (H, W, Tt) output block (VMEM).
    pad_ref: (H+2p, W+2p, Tt) zero-padded scratch (VMEM, persistent).
    """
    p = (K - 1) // 2
    # Build the zero 'same' border in VMEM.  Re-zeroed every grid step so the
    # result never depends on which TensorCore ran the previous step (megacore
    # safety); the extra VMEM stores are negligible next to the HBM DMA.
    pad_ref[...] = jnp.zeros_like(pad_ref)
    pad_ref[p:p + H, p:p + W, :] = x_ref[...]

    # Hoist the K*K SMEM scalar tap reads out of the stencil loop.
    taps = [w_ref[i] for i in range(K * K)]

    # One partial accumulator per kernel row -> ILP across the 4 VALUs
    # (each tap is 2 dependent VALU ops: no f32 FMA on v5e/v6e).
    # dy shifts the leading axis, dx shifts sublanes: plain vld at shifted base
    # addresses, never crossing the 128-lane vreg boundary (T is on lanes).
    partials = []
    for dy in range(K):
        part = taps[dy * K] * pad_ref[dy:dy + H, 0:W, :]
        for dx in range(1, K):
            part = part + taps[dy * K + dx] * pad_ref[dy:dy + H, dx:dx + W, :]
        partials.append(part)

    acc = jnp.full(o_ref.shape, b_ref[0], dtype=jnp.float32)  # bias epilogue
    for part in partials:
        acc = acc + part
    o_ref[...] = acc


def conv2d_1to1_same(x_hwt, w, b):
    """'same' 1->1 conv applied independently to every time frame.

    x_hwt: (H, W, T) f32;  w: (K, K) f32;  b: (1,) f32.  Returns (H, W, T) f32.
    No wrapper-side transposes / pads: the kernel consumes x_hwt as-is.
    """
    H, W, T = x_hwt.shape
    K = w.shape[0]
    p = (K - 1) // 2
    Tt, vmem_limit = _plan_tiling(H, W, T, K)
    nT = pl.cdiv(T, Tt)

    kernel = functools.partial(_conv3dc_stencil_kernel, K=K, H=H, W=W)
    return pl.pallas_call(
        kernel,
        out_shape=jax.ShapeDtypeStruct((H, W, T), jnp.float32),
        grid=(nT,),
        in_specs=[
            pl.BlockSpec((H, W, Tt), lambda t: (0, 0, t)),         # frame chunk
            pl.BlockSpec(memory_space=pltpu.MemorySpace.SMEM),     # conv taps
            pl.BlockSpec(memory_space=pltpu.MemorySpace.SMEM),     # bias
        ],
        out_specs=pl.BlockSpec((H, W, Tt), lambda t: (0, 0, t)),
        scratch_shapes=[pltpu.VMEM((H + 2 * p, W + 2 * p, Tt), jnp.float32)],
        compiler_params=pltpu.CompilerParams(
            dimension_semantics=("parallel",),
            vmem_limit_bytes=vmem_limit,
        ),
    )(x_hwt, w.reshape(K * K), b.reshape(1))


def conv3dc_forward(params, x):
    """Conv3dC.forward: only convR participates, matching the PyTorch module."""
    # TODO(synk): convI is instantiated by the PyTorch module but never applied
    # in its forward(); it is carried here as an unused parameter as well.
    return conv2d_1to1_same(x, params["wR"], params["bR"])


def make_conv3dc_params(key, K=3):
    """Deterministic nn.Conv2d(1, 1, K)-style init for convR / convI."""
    std = 1.0 / math.sqrt(K * K)      # fan_in = Cin * K * K
    ks = jax.random.split(key, 4)
    return {
        "wR": jax.random.uniform(ks[0], (K, K), jnp.float32, -std, std),
        "bR": jax.random.uniform(ks[1], (1,), jnp.float32, -std, std),
        "wI": jax.random.uniform(ks[2], (K, K), jnp.float32, -std, std),
        "bI": jax.random.uniform(ks[3], (1,), jnp.float32, -std, std),
    }


def conv3dc_reference(params, x):
    """Pure-jnp reference (same accumulation structure as the kernel)."""
    H, W, T = x.shape
    w, b = params["wR"], params["bR"]
    K = w.shape[0]
    p = (K - 1) // 2
    xp = jnp.pad(x, ((p, p), (p, p), (0, 0)))
    out = jnp.full((H, W, T), b[0], jnp.float32)
    for dy in range(K):
        for dx in range(K):
            out = out + w[dy, dx] * xp[dy:dy + H, dx:dx + W, :]
    return out


if __name__ == "__main__":
    key = jax.random.PRNGKey(0)
    kx, kp = jax.random.split(key)
    H, W, T, K = 16, 16, 8, 3
    x = jax.random.normal(kx, (H, W, T), jnp.float32)
    params = make_conv3dc_params(kp, K)

    fwd = jax.jit(conv3dc_forward)
    out = jax.block_until_ready(fwd(params, x))

    assert out.shape == (H, W, T)
    assert bool(jnp.all(jnp.isfinite(out)))

    ref = conv3dc_reference(params, x)
    assert bool(jnp.allclose(out, ref, atol=1e-5, rtol=1e-5)), (
        float(jnp.max(jnp.abs(out - ref))))

    print("KERNEL_OK")
</pallas_src>

<mosaic_0001>
module attributes {stable_mosaic.version = 11 : i64} {
  func.func @_conv3dc_stencil_kernel(%arg0: i32, %arg1: memref<16x16x8xf32, #tpu.memory_space<vmem>>, %arg2: memref<9xf32, #tpu.memory_space<smem>>, %arg3: memref<1xf32, #tpu.memory_space<smem>>, %arg4: memref<16x16x8xf32, #tpu.memory_space<vmem>>, %arg5: memref<18x18x8xf32, #tpu.memory_space<vmem>>) attributes {dimension_semantics = [#tpu.dimension_semantics<parallel>], iteration_bounds = array<i64: 1>, scalar_prefetch = 0 : i64, scratch_operands = 1 : i64, tpu.core_type = #tpu.core_type<tc>, window_params = [{transform_indices = @transform_0, window_bounds = array<i64: 16, 16, 8>}, {transform_indices = @transform_1, window_bounds = array<i64: 9>}, {transform_indices = @transform_2, window_bounds = array<i64: 1>}, {transform_indices = @transform_3, window_bounds = array<i64: 16, 16, 8>}]} {
    %cst = arith.constant 0.000000e+00 : f32
    %0 = vector.broadcast %cst : f32 to vector<18x18x8xf32>
    %c0 = arith.constant 0 : index
    %c0_0 = arith.constant 0 : index
    %c0_1 = arith.constant 0 : index
    %1 = vector.load %arg5[%c0, %c0_0, %c0_1] : memref<18x18x8xf32, #tpu.memory_space<vmem>>, vector<18x18x8xf32>
    tpu.vector_store %arg5[%c0, %c0_0, %c0_1], %0 {strides = array<i32>} : memref<18x18x8xf32, #tpu.memory_space<vmem>>, vector<18x18x8xf32>,
    %c0_2 = arith.constant 0 : index
    %c0_3 = arith.constant 0 : index
    %c0_4 = arith.constant 0 : index
    %2 = vector.load %arg1[%c0_2, %c0_3, %c0_4] : memref<16x16x8xf32, #tpu.memory_space<vmem>>, vector<16x16x8xf32>
    %c1 = arith.constant 1 : index
    %c1_5 = arith.constant 1 : index
    %c0_6 = arith.constant 0 : index
    %3 = vector.load %arg5[%c1, %c1_5, %c0_6] : memref<18x18x8xf32, #tpu.memory_space<vmem>>, vector<16x16x8xf32>
    tpu.vector_store %arg5[%c1, %c1_5, %c0_6], %2 {strides = array<i32>} : memref<18x18x8xf32, #tpu.memory_space<vmem>>, vector<16x16x8xf32>,
    %c0_7 = arith.constant 0 : index
    %4 = memref.load %arg2[%c0_7] : memref<9xf32, #tpu.memory_space<smem>>
    %c1_8 = arith.constant 1 : index
    %5 = memref.load %arg2[%c1_8] : memref<9xf32, #tpu.memory_space<smem>>
    %c2 = arith.constant 2 : index
    %6 = memref.load %arg2[%c2] : memref<9xf32, #tpu.memory_space<smem>>
    %c3 = arith.constant 3 : index
    %7 = memref.load %arg2[%c3] : memref<9xf32, #tpu.memory_space<smem>>
    %c4 = arith.constant 4 : index
    %8 = memref.load %arg2[%c4] : memref<9xf32, #tpu.memory_space<smem>>
    %c5 = arith.constant 5 : index
    %9 = memref.load %arg2[%c5] : memref<9xf32, #tpu.memory_space<smem>>
    %c6 = arith.constant 6 : index
    %10 = memref.load %arg2[%c6] : memref<9xf32, #tpu.memory_space<smem>>
    %c7 = arith.constant 7 : index
    %11 = memref.load %arg2[%c7] : memref<9xf32, #tpu.memory_space<smem>>
    %c8 = arith.constant 8 : index
    %12 = memref.load %arg2[%c8] : memref<9xf32, #tpu.memory_space<smem>>
    %c0_9 = arith.constant 0 : index
    %c0_10 = arith.constant 0 : index
    %c0_11 = arith.constant 0 : index
    %13 = vector.load %arg5[%c0_9, %c0_10, %c0_11] : memref<18x18x8xf32, #tpu.memory_space<vmem>>, vector<16x16x8xf32>
    %14 = vector.broadcast %4 : f32 to vector<16x16x8xf32>
    %15 = arith.mulf %14, %13 : vector<16x16x8xf32>
    %c0_12 = arith.constant 0 : index
    %c1_13 = arith.constant 1 : index
    %c0_14 = arith.constant 0 : index
    %16 = vector.load %arg5[%c0_12, %c1_13, %c0_14] : memref<18x18x8xf32, #tpu.memory_space<vmem>>, vector<16x16x8xf32>
    %17 = vector.broadcast %5 : f32 to vector<16x16x8xf32>
    %18 = arith.mulf %17, %16 : vector<16x16x8xf32>
    %19 = arith.addf %15, %18 : vector<16x16x8xf32>
    %c0_15 = arith.constant 0 : index
    %c2_16 = arith.constant 2 : index
    %c0_17 = arith.constant 0 : index
    %20 = vector.load %arg5[%c0_15, %c2_16, %c0_17] : memref<18x18x8xf32, #tpu.memory_space<vmem>>, vector<16x16x8xf32>
    %21 = vector.broadcast %6 : f32 to vector<16x16x8xf32>
    %22 = arith.mulf %21, %20 : vector<16x16x8xf32>
    %23 = arith.addf %19, %22 : vector<16x16x8xf32>
    %c1_18 = arith.constant 1 : index
    %c0_19 = arith.constant 0 : index
    %c0_20 = arith.constant 0 : index
    %24 = vector.load %arg5[%c1_18, %c0_19, %c0_20] : memref<18x18x8xf32, #tpu.memory_space<vmem>>, vector<16x16x8xf32>
    %25 = vector.broadcast %7 : f32 to vector<16x16x8xf32>
    %26 = arith.mulf %25, %24 : vector<16x16x8xf32>
    %c1_21 = arith.constant 1 : index
    %c1_22 = arith.constant 1 : index
    %c0_23 = arith.constant 0 : index
    %27 = vector.load %arg5[%c1_21, %c1_22, %c0_23] : memref<18x18x8xf32, #tpu.memory_space<vmem>>, vector<16x16x8xf32>
    %28 = vector.broadcast %8 : f32 to vector<16x16x8xf32>
    %29 = arith.mulf %28, %27 : vector<16x16x8xf32>
    %30 = arith.addf %26, %29 : vector<16x16x8xf32>
    %c1_24 = arith.constant 1 : index
    %c2_25 = arith.constant 2 : index
    %c0_26 = arith.constant 0 : index
    %31 = vector.load %arg5[%c1_24, %c2_25, %c0_26] : memref<18x18x8xf32, #tpu.memory_space<vmem>>, vector<16x16x8xf32>
    %32 = vector.broadcast %9 : f32 to vector<16x16x8xf32>
    %33 = arith.mulf %32, %31 : vector<16x16x8xf32>
    %34 = arith.addf %30, %33 : vector<16x16x8xf32>
    %c2_27 = arith.constant 2 : index
    %c0_28 = arith.constant 0 : index
    %c0_29 = arith.constant 0 : index
    %35 = vector.load %arg5[%c2_27, %c0_28, %c0_29] : memref<18x18x8xf32, #tpu.memory_space<vmem>>, vector<16x16x8xf32>
    %36 = vector.broadcast %10 : f32 to vector<16x16x8xf32>
    %37 = arith.mulf %36, %35 : vector<16x16x8xf32>
    %c2_30 = arith.constant 2 : index
    %c1_31 = arith.constant 1 : index
    %c0_32 = arith.constant 0 : index
    %38 = vector.load %arg5[%c2_30, %c1_31, %c0_32] : memref<18x18x8xf32, #tpu.memory_space<vmem>>, vector<16x16x8xf32>
    %39 = vector.broadcast %11 : f32 to vector<16x16x8xf32>
    %40 = arith.mulf %39, %38 : vector<16x16x8xf32>
    %41 = arith.addf %37, %40 : vector<16x16x8xf32>
    %c2_33 = arith.constant 2 : index
    %c2_34 = arith.constant 2 : index
    %c0_35 = arith.constant 0 : index
    %42 = vector.load %arg5[%c2_33, %c2_34, %c0_35] : memref<18x18x8xf32, #tpu.memory_space<vmem>>, vector<16x16x8xf32>
    %43 = vector.broadcast %12 : f32 to vector<16x16x8xf32>
    %44 = arith.mulf %43, %42 : vector<16x16x8xf32>
    %45 = arith.addf %41, %44 : vector<16x16x8xf32>
    %c0_36 = arith.constant 0 : index
    %46 = memref.load %arg3[%c0_36] : memref<1xf32, #tpu.memory_space<smem>>
    %47 = vector.broadcast %46 : f32 to vector<16x16x8xf32>
    %48 = arith.addf %47, %23 : vector<16x16x8xf32>
    %49 = arith.addf %48, %34 : vector<16x16x8xf32>
    %50 = arith.addf %49, %45 : vector<16x16x8xf32>
    %c0_37 = arith.constant 0 : index
    %c0_38 = arith.constant 0 : index
    %c0_39 = arith.constant 0 : index
    %51 = vector.load %arg4[%c0_37, %c0_38, %c0_39] : memref<16x16x8xf32, #tpu.memory_space<vmem>>, vector<16x16x8xf32>
    tpu.vector_store %arg4[%c0_37, %c0_38, %c0_39], %50 {strides = array<i32>} : memref<16x16x8xf32, #tpu.memory_space<vmem>>, vector<16x16x8xf32>,
    return
  }
  func.func @transform_0(%arg0: i32) -> (i32, i32, i32) {
    %c0_i32 = arith.constant 0 : i32
    %c0_i32_0 = arith.constant 0 : i32
    %c0_i32_1 = arith.constant 0 : i32
    return %c0_i32, %c0_i32_0, %arg0 : i32, i32, i32
  }
  func.func @transform_1(%arg0: i32) -> i32 {
    %c0_i32 = arith.constant 0 : i32
    %c0_i32_0 = arith.constant 0 : i32
    return %c0_i32 : i32
  }
  func.func @transform_2(%arg0: i32) -> i32 {
    %c0_i32 = arith.constant 0 : i32
    %c0_i32_0 = arith.constant 0 : i32
    return %c0_i32 : i32
  }
  func.func @transform_3(%arg0: i32) -> (i32, i32, i32) {
    %c0_i32 = arith.constant 0 : i32
    %c0_i32_0 = arith.constant 0 : i32
    %c0_i32_1 = arith.constant 0 : i32
    return %c0_i32, %c0_i32_0, %arg0 : i32, i32, i32
  }
}

</mosaic_0001>

<bundles_post_ra>
// kernel: conv3dc_forward.1
= control target key start
LH: loop header
LB: loop body
LE: loop exit
PB: predicated region body
PF: predicated region fallthrough
CT: control target
= control target key end

     0   :  { %9 = vsyncpa [#allocation5], 0  ;;  %s2220_s0 = inlined_call_operand.vmem [shape: f32[16,16,8], index: 0, kind: input, shape index: {}]   ;;  %s2221_s1 = inlined_call_operand.vmem [shape: f32[9], index: 1, kind: input, shape index: {}]   ;;  %s2222_s2 = inlined_call_operand.<no memory space> [shape: f32[1], index: 2, kind: input, shape index: {}]   ;;  %s2223_s3 = inlined_call_operand.vmem [shape: f32[16,16,8], index: 3, kind: output, shape index: {}]  }
   0x1   :  { %s18_s14 = sshll.u32 %s2221_s1, 4  ;;  %s19_s14 = int_to_ptr.vmem [resolvable:$true] %s18_s14 }
   0x2   :  { %s1081_s15 = scalar_lea.vmem %s19_s14, 16  ;;  %p1086_p1 = scmp.lt.s32.totalorder %s19_s14, %s19_s14 }
   0x3   :  { %p1082_p0 = scmp.ne.s32.totalorder %s19_s14, %s1081_s15  ;;  %p1087_p2 = scmp.lt.s32.totalorder %s1081_s15, %s1081_s15 }
   0x5   :  { %p1088_p3 = por %p1087_p2, %p1086_p1 }
   0x7   :  { %p1089_p4 = pnand %p1088_p3, %p1082_p0 }
   0x9   :  { %1092 = shalt.err (!%p1089_p4)
}
   0xa   :  { %s1095_s16 = smov [#allocation4]  }
   0xb   :  { %21 = dma.vmem_to_smem %s19_s14, 16, %s1095_s16, [#allocation5]  }
   0xc   :  { %1093 = dma.done.wait [#allocation5], 16  }
   0xd   :  { %1094 = vsyncadd [#allocation5], 4294967280 }
   0xe   :  { %27 = sfence }
   0xf   :  { %vm28_vm0 = vcmask 64512   ;;  %vm31_vm1 = vcmask 58368   ;;  %v84_v0 = vld [vmem:[%s2220_s0] sm:$0xff]  ;;  %v85_v1 = vld [vmem:[%s2220_s0 + $0x8] sm:$0xff]  ;;  %v86_v2 = vld [vmem:[%s2220_s0 + $0x10] sm:$0xff]  ;;  %v1096_v3 = vmov 0.0   ;;  %v1339_v43 = vstv %s2222_s2 }
  0x10   :  { %29 = vst.msk [vmem:[#allocation2] sm:$0xff] %vm28_vm0, %v1096_v3  ;;  %30 = vst.msk [vmem:[#allocation2 + $0x8] sm:$0xff] %vm28_vm0, %v1096_v3  ;;  %v87_v4 = vld [vmem:[%s2220_s0 + $0x18] sm:$0xff]  ;;  %v88_v5 = vld [vmem:[%s2220_s0 + $0x20] sm:$0xff]  ;;  %s1192_s28 = sld [smem:[#allocation4]]  ;;  %s1209_s8 = sld [smem:[#allocation4 + $0x1]] }
  0x11   :  { %33 = vst.msk [vmem:[#allocation2 + $0x18] sm:$0xff] %vm28_vm0, %v1096_v3  ;;  %34 = vst.msk [vmem:[#allocation2 + $0x20] sm:$0xff] %vm28_vm0, %v1096_v3  ;;  %v89_v6 = vld [vmem:[%s2220_s0 + $0x28] sm:$0xff]  ;;  %v90_v7 = vld [vmem:[%s2220_s0 + $0x30] sm:$0xff]  ;;  %s1223_s15 = sld [smem:[#allocation4 + $0x2]]  ;;  %s1237_s21 = sld [smem:[#allocation4 + $0x3]] }
  0x12   :  { %36 = vst.msk [vmem:[#allocation2 + $0x30] sm:$0xff] %vm28_vm0, %v1096_v3  ;;  %37 = vst.msk [vmem:[#allocation2 + $0x38] sm:$0xff] %vm28_vm0, %v1096_v3  ;;  %v91_v8 = vld [vmem:[%s2220_s0 + $0x38] sm:$0xff]  ;;  %v92_v9 = vld [vmem:[%s2220_s0 + $0x40] sm:$0xff]  ;;  %s1251_s29 = sld [smem:[#allocation4 + $0x4]]  ;;  %s1265_s10 = sld [smem:[#allocation4 + $0x5]] }
  0x13   :  { %39 = vst.msk [vmem:[#allocation2 + $0x48] sm:$0xff] %vm28_vm0, %v1096_v3  ;;  %40 = vst.msk [vmem:[#allocation2 + $0x50] sm:$0xff] %vm28_vm0, %v1096_v3  ;;  %v93_v10 = vld [vmem:[%s2220_s0 + $0x48] sm:$0xff]  ;;  %v94_v11 = vld [vmem:[%s2220_s0 + $0x50] sm:$0xff]  ;;  %s1279_s18 = sld [smem:[#allocation4 + $0x6]] }
  0x14   :  { %42 = vst.msk [vmem:[#allocation2 + $0x60] sm:$0xff] %vm28_vm0, %v1096_v3  ;;  %43 = vst.msk [vmem:[#allocation2 + $0x68] sm:$0xff] %vm28_vm0, %v1096_v3  ;;  %v95_v12 = vld [vmem:[%s2220_s0 + $0x58] sm:$0xff]  ;;  %v96_v13 = vld [vmem:[%s2220_s0 + $0x60] sm:$0xff] }
  0x15   :  { %45 = vst.msk [vmem:[#allocation2 + $0x78] sm:$0xff] %vm28_vm0, %v1096_v3  ;;  %46 = vst.msk [vmem:[#allocation2 + $0x80] sm:$0xff] %vm28_vm0, %v1096_v3  ;;  %v97_v14 = vld [vmem:[%s2220_s0 + $0x68] sm:$0xff]  ;;  %v98_v15 = vld [vmem:[%s2220_s0 + $0x70] sm:$0xff] }
  0x16   :  { %48 = vst.msk [vmem:[#allocation2 + $0x90] sm:$0xff] %vm28_vm0, %v1096_v3  ;;  %49 = vst.msk [vmem:[#allocation2 + $0x98] sm:$0xff] %vm28_vm0, %v1096_v3  ;;  %v99_v16 = vld [vmem:[%s2220_s0 + $0x78] sm:$0xff]  ;;  %v100_v17 = vld [vmem:[%s2220_s0 + $0x80] sm:$0xff]  ;;  %v1282_v25 = vstv %s1192_s28  ;;  %s1296_s28 = sld [smem:[#allocation4 + $0x7]]  ;;  %v1299_v29 = vstv %s1209_s8  ;;  %s1313_s8 = sld [smem:[#allocation4 + $0x8]] }
  0x17   :  { %51 = vst.msk [vmem:[#allocation2 + $0xa8] sm:$0xff] %vm28_vm0, %v1096_v3  ;;  %52 = vst.msk [vmem:[#allocation2 + $0xb0] sm:$0xff] %vm28_vm0, %v1096_v3  ;;  %v101_v18 = vld [vmem:[%s2220_s0 + $0x88] sm:$0xff]  ;;  %v102_v19 = vld [vmem:[%s2220_s0 + $0x90] sm:$0xff]  ;;  %v1316_v33 = vstv %s1223_s15  ;;  %v1328_v37 = vstv %s1237_s21 }
  0x18   :  { %54 = vst.msk [vmem:[#allocation2 + $0xc0] sm:$0xff] %vm28_vm0, %v1096_v3  ;;  %55 = vst.msk [vmem:[#allocation2 + $0xc8] sm:$0xff] %vm28_vm0, %v1096_v3  ;;  %v103_v20 = vld [vmem:[%s2220_s0 + $0x98] sm:$0xff]  ;;  %v104_v21 = vld [vmem:[%s2220_s0 + $0xa0] sm:$0xff]  ;;  %v1334_v42 = vstv %s1251_s29  ;;  %v1345_v49 = vstv %s1265_s10 }
  0x19   :  { %57 = vst.msk [vmem:[#allocation2 + $0xd8] sm:$0xff] %vm28_vm0, %v1096_v3  ;;  %58 = vst.msk [vmem:[#allocation2 + $0xe0] sm:$0xff] %vm28_vm0, %v1096_v3  ;;  %v105_v22 = vld [vmem:[%s2220_s0 + $0xa8] sm:$0xff]  ;;  %v106_v23 = vld [vmem:[%s2220_s0 + $0xb0] sm:$0xff]  ;;  %v1352_v53 = vstv %s1279_s18 }
  0x1a   :  { %60 = vst.msk [vmem:[#allocation2 + $0xf0] sm:$0xff] %vm28_vm0, %v1096_v3  ;;  %61 = vst.msk [vmem:[#allocation2 + $0xf8] sm:$0xff] %vm28_vm0, %v1096_v3  ;;  %v107_v24 = vld [vmem:[%s2220_s0 + $0xb8] sm:$0xff]  ;;  %v108_v26 = vld [vmem:[%s2220_s0 + $0xc0] sm:$0xff] }
  0x1b   :  { %63 = vst.msk [vmem:[#allocation2 + $0x108] sm:$0xff] %vm28_vm0, %v1096_v3  ;;  %64 = vst.msk [vmem:[#allocation2 + $0x110] sm:$0xff] %vm28_vm0, %v1096_v3  ;;  %v109_v27 = vld [vmem:[%s2220_s0 + $0xc8] sm:$0xff]  ;;  %v110_v28 = vld [vmem:[%s2220_s0 + $0xd0] sm:$0xff] }
  0x1c   :  { %66 = vst.msk [vmem:[#allocation2 + $0x120] sm:$0xff] %vm28_vm0, %v1096_v3  ;;  %67 = vst.msk [vmem:[#allocation2 + $0x128] sm:$0xff] %vm28_vm0, %v1096_v3  ;;  %v111_v30 = vld [vmem:[%s2220_s0 + $0xd8] sm:$0xff]  ;;  %v112_v31 = vld [vmem:[%s2220_s0 + $0xe0] sm:$0xff]  ;;  %v1362_v60 = vstv %s1296_s28 }
  0x1d   :  { %69 = vst.msk [vmem:[#allocation2 + $0x138] sm:$0xff] %vm28_vm0, %v1096_v3  ;;  %70 = vst.msk [vmem:[#allocation2 + $0x140] sm:$0xff] %vm28_vm0, %v1096_v3  ;;  %v113_v32 = vld [vmem:[%s2220_s0 + $0xe8] sm:$0xff]  ;;  %v114_v34 = vld [vmem:[%s2220_s0 + $0xf0] sm:$0xff] }
  0x1e   :  { %72 = vst.msk [vmem:[#allocation2 + $0x150] sm:$0xff] %vm28_vm0, %v1096_v3  ;;  %73 = vst.msk [vmem:[#allocation2 + $0x158] sm:$0xff] %vm28_vm0, %v1096_v3  ;;  %v115_v35 = vld [vmem:[%s2220_s0 + $0xf8] sm:$0xff]  ;;  %v158_v36 = vld [vmem:[#allocation2] sm:$0xff] }
  0x1f   :  { %75 = vst.msk [vmem:[#allocation2 + $0x168] sm:$0xff] %vm28_vm0, %v1096_v3  ;;  %76 = vst.msk [vmem:[#allocation2 + $0x170] sm:$0xff] %vm28_vm0, %v1096_v3  ;;  %v191_v38 = vmul.f32 %v1282_v25, %v158_v36  ;;  %v223_v39 = vld [vmem:[#allocation2 + $0x1] sm:$0xff] }
  0x20   :  { %78 = vst.msk [vmem:[#allocation2 + $0x180] sm:$0xff] %vm28_vm0, %v1096_v3  ;;  %79 = vst.msk [vmem:[#allocation2 + $0x188] sm:$0xff] %vm28_vm0, %v1096_v3  ;;  %v320_v40 = vld [vmem:[#allocation2 + $0x2] sm:$0xff]  ;;  %v256_v44 = vmul.f32 %v1299_v29, %v223_v39 }
  0x21   :  { %81 = vst.msk [vmem:[#allocation2 + $0x198] sm:$0xff] %vm28_vm0, %v1096_v3  ;;  %82 = vst.msk [vmem:[#allocation2 + $0x1a0] sm:$0xff] %vm28_vm0, %v1096_v3  ;;  %v353_v45 = vmul.f32 %v1316_v33, %v320_v40  ;;  %v159_v56 = vld [vmem:[#allocation2 + $0x8] sm:$0xff] }
  0x22   :  { %32 = vst.msk [vmem:[#allocation2 + $0x10] sm:$0x3] %vm31_vm1, %v1096_v3  ;;  %35 = vst.msk [vmem:[#allocation2 + $0x28] sm:$0x3] %vm31_vm1, %v1096_v3  ;;  %v288_v58 = vadd.f32 %v256_v44, %v191_v38  ;;  %v192_v61 = vmul.f32 %v1282_v25, %v159_v56 }
  0x23   :  { %38 = vst.msk [vmem:[#allocation2 + $0x40] sm:$0x3] %vm31_vm1, %v1096_v3  ;;  %41 = vst.msk [vmem:[#allocation2 + $0x58] sm:$0x3] %vm31_vm1, %v1096_v3 }
  0x24   :  { %44 = vst.msk [vmem:[#allocation2 + $0x70] sm:$0x3] %vm31_vm1, %v1096_v3  ;;  %47 = vst.msk [vmem:[#allocation2 + $0x88] sm:$0x3] %vm31_vm1, %v1096_v3 }
  0x25   :  { %50 = vst.msk [vmem:[#allocation2 + $0xa0] sm:$0x3] %vm31_vm1, %v1096_v3  ;;  %53 = vst.msk [vmem:[#allocation2 + $0xb8] sm:$0x3] %vm31_vm1, %v1096_v3 }
  0x26   :  { %56 = vst.msk [vmem:[#allocation2 + $0xd0] sm:$0x3] %vm31_vm1, %v1096_v3  ;;  %59 = vst.msk [vmem:[#allocation2 + $0xe8] sm:$0x3] %vm31_vm1, %v1096_v3 }
  0x27   :  { %62 = vst.msk [vmem:[#allocation2 + $0x100] sm:$0x3] %vm31_vm1, %v1096_v3  ;;  %65 = vst.msk [vmem:[#allocation2 + $0x118] sm:$0x3] %vm31_vm1, %v1096_v3 }
  0x28   :  { %68 = vst.msk [vmem:[#allocation2 + $0x130] sm:$0x3] %vm31_vm1, %v1096_v3  ;;  %71 = vst.msk [vmem:[#allocation2 + $0x148] sm:$0x3] %vm31_vm1, %v1096_v3 }
  0x29   :  { %74 = vst.msk [vmem:[#allocation2 + $0x160] sm:$0x3] %vm31_vm1, %v1096_v3  ;;  %77 = vst.msk [vmem:[#allocation2 + $0x178] sm:$0x3] %vm31_vm1, %v1096_v3  ;;  %v224_v62 = vld [vmem:[#allocation2 + $0x9] sm:$0xff] }
  0x2a   :  { %80 = vst.msk [vmem:[#allocation2 + $0x190] sm:$0x3] %vm31_vm1, %v1096_v3  ;;  %83 = vst.msk [vmem:[#allocation2 + $0x1a8] sm:$0x3] %vm31_vm1, %v1096_v3  ;;  %v321_v63 = vld [vmem:[#allocation2 + $0xa] sm:$0xff]  ;;  %v1368_v3 = vstv %s1313_s8 }
  0x2b   :  { %117 = vst.msk [vmem:[#allocation2 + $0x19] sm:$0xff] %vm28_vm0, %v84_v0  ;;  %118 = vst.msk [vmem:[#allocation2 + $0x21] sm:$0xff] %vm28_vm0, %v85_v1 }
  0x2c   :  { %119 = vst.msk [vmem:[#allocation2 + $0x31] sm:$0xff] %vm28_vm0, %v86_v2  ;;  %120 = vst.msk [vmem:[#allocation2 + $0x39] sm:$0xff] %vm28_vm0, %v87_v4  ;;  %v257_v4 = vmul.f32 %v1299_v29, %v224_v62 }
  0x2d   :  { %121 = vst.msk [vmem:[#allocation2 + $0x49] sm:$0xff] %vm28_vm0, %v88_v5  ;;  %122 = vst.msk [vmem:[#allocation2 + $0x51] sm:$0xff] %vm28_vm0, %v89_v6 }
  0x2e   :  { %123 = vst.msk [vmem:[#allocation2 + $0x61] sm:$0xff] %vm28_vm0, %v90_v7  ;;  %124 = vst.msk [vmem:[#allocation2 + $0x69] sm:$0xff] %vm28_vm0, %v91_v8  ;;  %v385_v8 = vadd.f32 %v353_v45, %v288_v58 }
  0x2f   :  { %125 = vst.msk [vmem:[#allocation2 + $0x79] sm:$0xff] %vm28_vm0, %v92_v9  ;;  %126 = vst.msk [vmem:[#allocation2 + $0x81] sm:$0xff] %vm28_vm0, %v93_v10  ;;  %v354_v10 = vmul.f32 %v1316_v33, %v321_v63 }
  0x30   :  { %127 = vst.msk [vmem:[#allocation2 + $0x91] sm:$0xff] %vm28_vm0, %v94_v11  ;;  %128 = vst.msk [vmem:[#allocation2 + $0x99] sm:$0xff] %vm28_vm0, %v95_v12 }
  0x31   :  { %129 = vst.msk [vmem:[#allocation2 + $0xa9] sm:$0xff] %vm28_vm0, %v96_v13  ;;  %130 = vst.msk [vmem:[#allocation2 + $0xb1] sm:$0xff] %vm28_vm0, %v97_v14 }
  0x32   :  { %131 = vst.msk [vmem:[#allocation2 + $0xc1] sm:$0xff] %vm28_vm0, %v98_v15  ;;  %132 = vst.msk [vmem:[#allocation2 + $0xc9] sm:$0xff] %vm28_vm0, %v99_v16  ;;  %v417_v41 = vld [vmem:[#allocation2 + $0x18] sm:$0xff]  ;;  %v418_v0 = vld [vmem:[#allocation2 + $0x20] sm:$0xff]  ;;  %v289_v16 = vadd.f32 %v257_v4, %v192_v61 }
  0x33   :  { %133 = vst.msk [vmem:[#allocation2 + $0xd9] sm:$0xff] %vm28_vm0, %v100_v17  ;;  %134 = vst.msk [vmem:[#allocation2 + $0xe1] sm:$0xff] %vm28_vm0, %v101_v18  ;;  %v450_v46 = vmul.f32 %v1328_v37, %v417_v41  ;;  %v482_v47 = vld [vmem:[#allocation2 + $0x19] sm:$0xff]  ;;  %v1347_v50 = vld [vmem:[#allocation2 + $0x30] sm:$0xff]  ;;  %v193_v57 = vmul.f32 %v417_v41, %v1282_v25  ;;  %v451_v11 = vmul.f32 %v1328_v37, %v418_v0 }
  0x34   :  { %135 = vst.msk [vmem:[#allocation2 + $0xf1] sm:$0xff] %vm28_vm0, %v102_v19  ;;  %136 = vst.msk [vmem:[#allocation2 + $0xf9] sm:$0xff] %vm28_vm0, %v103_v20  ;;  %v579_v48 = vld [vmem:[#allocation2 + $0x1a] sm:$0xff]  ;;  %v515_v51 = vmul.f32 %v1334_v42, %v482_v47  ;;  %v1354_v54 = vld [vmem:[#allocation2 + $0x31] sm:$0xff]  ;;  %v710_v59 = vmul.f32 %v1352_v53, %v1347_v50  ;;  %v938_v18 = vadd.f32 %v1339_v43, %v385_v8 }
  0x35   :  { %137 = vst.msk [vmem:[#allocation2 + $0x109] sm:$0xff] %vm28_vm0, %v104_v21  ;;  %138 = vst.msk [vmem:[#allocation2 + $0x111] sm:$0xff] %vm28_vm0, %v105_v22  ;;  %v612_v52 = vmul.f32 %v1345_v49, %v579_v48  ;;  %v1356_v55 = vld [vmem:[#allocation2 + $0x32] sm:$0xff]  ;;  %v775_v2 = vmul.f32 %v1362_v60, %v1354_v54  ;;  %v483_v5 = vld [vmem:[#allocation2 + $0x21] sm:$0xff]  ;;  %v452_v38 = vmul.f32 %v1347_v50, %v1328_v37 }
  0x36   :  { %139 = vst.msk [vmem:[#allocation2 + $0x121] sm:$0xff] %vm28_vm0, %v106_v23  ;;  %140 = vst.msk [vmem:[#allocation2 + $0x129] sm:$0xff] %vm28_vm0, %v107_v24  ;;  %v547_v1 = vadd.f32 %v515_v51, %v450_v46  ;;  %v580_v6 = vld [vmem:[#allocation2 + $0x22] sm:$0xff]  ;;  %v1371_v7 = vld [vmem:[#allocation2 + $0x38] sm:$0xff]  ;;  %v872_v9 = vmul.f32 %v1368_v3, %v1356_v55  ;;  %v516_v17 = vmul.f32 %v1334_v42, %v483_v5 }
  0x37   :  { %141 = vst.msk [vmem:[#allocation2 + $0x139] sm:$0xff] %vm28_vm0, %v108_v26  ;;  %142 = vst.msk [vmem:[#allocation2 + $0x141] sm:$0xff] %vm28_vm0, %v109_v27  ;;  %v1377_v12 = vld [vmem:[#allocation2 + $0x39] sm:$0xff]  ;;  %v807_v15 = vadd.f32 %v775_v2, %v710_v59  ;;  %v613_v19 = vmul.f32 %v1345_v49, %v580_v6  ;;  %v711_v20 = vmul.f32 %v1352_v53, %v1371_v7  ;;  %v1401_v40 = vld [vmem:[#allocation2 + $0x4a] sm:$0xff] }
  0x38   :  { %143 = vst.msk [vmem:[#allocation2 + $0x151] sm:$0xff] %vm28_vm0, %v110_v28  ;;  %144 = vst.msk [vmem:[#allocation2 + $0x159] sm:$0xff] %vm28_vm0, %v111_v30  ;;  %v1379_v13 = vld [vmem:[#allocation2 + $0x3a] sm:$0xff]  ;;  %v644_v14 = vadd.f32 %v612_v52, %v547_v1  ;;  %v776_v21 = vmul.f32 %v1362_v60, %v1377_v12  ;;  %v386_v23 = vadd.f32 %v354_v10, %v289_v16  ;;  %v1417_v61 = vld [vmem:[#allocation2 + $0x50] sm:$0xff] }
  0x39   :  { %145 = vst.msk [vmem:[#allocation2 + $0x169] sm:$0xff] %vm28_vm0, %v112_v31  ;;  %146 = vst.msk [vmem:[#allocation2 + $0x171] sm:$0xff] %vm28_vm0, %v113_v32  ;;  %v904_v22 = vadd.f32 %v872_v9, %v807_v15  ;;  %v548_v24 = vadd.f32 %v516_v17, %v451_v11  ;;  %v873_v26 = vmul.f32 %v1368_v3, %v1379_v13  ;;  %v1392_v32 = vld [vmem:[#allocation2 + $0x48] sm:$0xff]  ;;  %v1419_v62 = vld [vmem:[#allocation2 + $0x51] sm:$0xff] }
  0x3a   :  { %147 = vst.msk [vmem:[#allocation2 + $0x181] sm:$0xff] %vm28_vm0, %v114_v34  ;;  %148 = vst.msk [vmem:[#allocation2 + $0x189] sm:$0xff] %vm28_vm0, %v115_v35  ;;  %v970_v27 = vadd.f32 %v938_v18, %v644_v14  ;;  %v808_v28 = vadd.f32 %v776_v21, %v711_v20  ;;  %v258_v30 = vmul.f32 %v482_v47, %v1299_v29  ;;  %v1394_v34 = vld [vmem:[#allocation2 + $0x49] sm:$0xff]  ;;  %v1422_v8 = vld [vmem:[#allocation2 + $0x52] sm:$0xff] }
  0x3b   :  { %v355_v31 = vmul.f32 %v579_v48, %v1316_v33  ;;  %v645_v35 = vadd.f32 %v613_v19, %v548_v24  ;;  %v939_v36 = vadd.f32 %v1339_v43, %v386_v23  ;;  %v517_v39 = vmul.f32 %v1354_v54, %v1334_v42  ;;  %v1447_v24 = vld [vmem:[#allocation2 + $0x60] sm:$0xff] }
  0x3c   :  { %v1002_v41 = vadd.f32 %v970_v27, %v904_v22  ;;  %v905_v44 = vadd.f32 %v873_v26, %v808_v28  ;;  %v290_v45 = vadd.f32 %v258_v30, %v193_v57  ;;  %v614_v46 = vmul.f32 %v1356_v55, %v1345_v49  ;;  %v1449_v26 = vld [vmem:[#allocation2 + $0x61] sm:$0xff] }
  0x3d   :  { %v971_v47 = vadd.f32 %v939_v36, %v645_v35  ;;  %v549_v48 = vadd.f32 %v517_v39, %v452_v38  ;;  %v712_v51 = vmul.f32 %v1352_v53, %v1392_v32  ;;  %v777_v52 = vmul.f32 %v1362_v60, %v1394_v34  ;;  %v1451_v27 = vld [vmem:[#allocation2 + $0x62] sm:$0xff] }
  0x3e   :  { %1034 = vst.msk [vmem:[%s2223_s3] sm:$0xff] %vm28_vm0, %v1002_v41  ;;  %v387_v56 = vadd.f32 %v355_v31, %v290_v45  ;;  %v874_v57 = vmul.f32 %v1368_v3, %v1401_v40  ;;  %v194_v58 = vmul.f32 %v418_v0, %v1282_v25  ;;  %v259_v59 = vmul.f32 %v483_v5, %v1299_v29 }
  0x3f   :  { %v1003_v63 = vadd.f32 %v971_v47, %v905_v44  ;;  %v646_v1 = vadd.f32 %v614_v46, %v549_v48  ;;  %v809_v2 = vadd.f32 %v777_v52, %v712_v51  ;;  %v356_v4 = vmul.f32 %v580_v6, %v1316_v33  ;;  %v1474_v51 = vld [vmem:[#allocation2 + $0x68] sm:$0xff] }
  0x40   :  { %v940_v9 = vadd.f32 %v1339_v43, %v387_v56  ;;  %v291_v10 = vadd.f32 %v259_v59, %v194_v58  ;;  %v453_v11 = vmul.f32 %v1371_v7, %v1328_v37  ;;  %v518_v0 = vmul.f32 %v1377_v12, %v1334_v42  ;;  %v1476_v52 = vld [vmem:[#allocation2 + $0x69] sm:$0xff] }
  0x41   :  { %1035 = vst.msk [vmem:[%s2223_s3 + $0x8] sm:$0xff] %vm28_vm0, %v1003_v63  ;;  %v906_v5 = vadd.f32 %v874_v57, %v809_v2  ;;  %v615_v6 = vmul.f32 %v1379_v13, %v1345_v49  ;;  %v713_v14 = vmul.f32 %v1352_v53, %v1417_v61  ;;  %v778_v15 = vmul.f32 %v1362_v60, %v1419_v62  ;;  %v1482_v63 = vld [vmem:[#allocation2 + $0x6a] sm:$0xff] }
  0x42   :  { %v972_v16 = vadd.f32 %v940_v9, %v646_v1  ;;  %v388_v17 = vadd.f32 %v356_v4, %v291_v10  ;;  %v550_v18 = vadd.f32 %v518_v0, %v453_v11  ;;  %v875_v19 = vmul.f32 %v1368_v3, %v1422_v8 }
  0x43   :  { %v810_v20 = vadd.f32 %v778_v15, %v713_v14  ;;  %v195_v21 = vmul.f32 %v1347_v50, %v1282_v25  ;;  %v260_v22 = vmul.f32 %v1354_v54, %v1299_v29  ;;  %v357_v23 = vmul.f32 %v1356_v55, %v1316_v33 }
  0x44   :  { %v1004_v28 = vadd.f32 %v972_v16, %v906_v5  ;;  %v647_v30 = vadd.f32 %v615_v6, %v550_v18  ;;  %v941_v31 = vadd.f32 %v1339_v43, %v388_v17  ;;  %v454_v35 = vmul.f32 %v1392_v32, %v1328_v37  ;;  %v1505_v18 = vld [vmem:[#allocation2 + $0x78] sm:$0xff] }
  0x45   :  { %v907_v50 = vadd.f32 %v875_v19, %v810_v20  ;;  %v292_v36 = vadd.f32 %v260_v22, %v195_v21  ;;  %v519_v54 = vmul.f32 %v1394_v34, %v1334_v42  ;;  %v616_v55 = vmul.f32 %v1401_v40, %v1345_v49  ;;  %v1507_v19 = vld [vmem:[#allocation2 + $0x79] sm:$0xff] }
  0x46   :  { %1036 = vst.msk [vmem:[%s2223_s3 + $0x10] sm:$0xff] %vm28_vm0, %v1004_v28  ;;  %v973_v38 = vadd.f32 %v941_v31, %v647_v30  ;;  %v714_v39 = vmul.f32 %v1352_v53, %v1447_v24  ;;  %v779_v41 = vmul.f32 %v1362_v60, %v1449_v26  ;;  %v876_v44 = vmul.f32 %v1368_v3, %v1451_v27  ;;  %v1509_v20 = vld [vmem:[#allocation2 + $0x7a] sm:$0xff] }
  0x47   :  { %v389_v45 = vadd.f32 %v357_v23, %v292_v36  ;;  %v551_v46 = vadd.f32 %v519_v54, %v454_v35  ;;  %v196_v47 = vmul.f32 %v1371_v7, %v1282_v25  ;;  %v261_v48 = vmul.f32 %v1377_v12, %v1299_v29 }
  0x48   :  { %v1005_v56 = vadd.f32 %v973_v38, %v907_v50  ;;  %v811_v57 = vadd.f32 %v779_v41, %v714_v39  ;;  %v358_v58 = vmul.f32 %v1379_v13, %v1316_v33  ;;  %v455_v59 = vmul.f32 %v1417_v61, %v1328_v37  ;;  %v1532_v41 = vld [vmem:[#allocation2 + $0x80] sm:$0xff] }
  0x49   :  { %v648_v1 = vadd.f32 %v616_v55, %v551_v46  ;;  %v942_v7 = vadd.f32 %v1339_v43, %v389_v45  ;;  %v293_v2 = vadd.f32 %v261_v48, %v196_v47  ;;  %v520_v12 = vmul.f32 %v1419_v62, %v1334_v42 }
  0x4a   :  { %1037 = vst.msk [vmem:[%s2223_s3 + $0x18] sm:$0xff] %vm28_vm0, %v1005_v56  ;;  %v908_v4 = vadd.f32 %v876_v44, %v811_v57  ;;  %v617_v13 = vmul.f32 %v1422_v8, %v1345_v49  ;;  %v715_v9 = vmul.f32 %v1352_v53, %v1474_v51  ;;  %v780_v10 = vmul.f32 %v1362_v60, %v1476_v52  ;;  %v1534_v44 = vld [vmem:[#allocation2 + $0x81] sm:$0xff] }
  0x4b   :  { %v974_v11 = vadd.f32 %v942_v7, %v648_v1  ;;  %v390_v0 = vadd.f32 %v358_v58, %v293_v2  ;;  %v552_v5 = vadd.f32 %v520_v12, %v455_v59  ;;  %v877_v6 = vmul.f32 %v1368_v3, %v1482_v63  ;;  %v1540_v56 = vld [vmem:[#allocation2 + $0x82] sm:$0xff] }
  0x4c   :  { %v812_v14 = vadd.f32 %v780_v10, %v715_v9  ;;  %v197_v15 = vmul.f32 %v1392_v32, %v1282_v25  ;;  %v262_v16 = vmul.f32 %v1394_v34, %v1299_v29  ;;  %v359_v17 = vmul.f32 %v1401_v40, %v1316_v33 }
  0x4d   :  { %v1006_v21 = vadd.f32 %v974_v11, %v908_v4  ;;  %v649_v22 = vadd.f32 %v617_v13, %v552_v5  ;;  %v943_v23 = vadd.f32 %v1339_v43, %v390_v0  ;;  %v456_v28 = vmul.f32 %v1447_v24, %v1328_v37  ;;  %v1563_v5 = vld [vmem:[#allocation2 + $0x90] sm:$0xff] }
  0x4e   :  { %v909_v32 = vadd.f32 %v877_v6, %v812_v14  ;;  %v294_v30 = vadd.f32 %v262_v16, %v197_v15  ;;  %v521_v34 = vmul.f32 %v1449_v26, %v1334_v42  ;;  %v618_v40 = vmul.f32 %v1451_v27, %v1345_v49  ;;  %v1565_v6 = vld [vmem:[#allocation2 + $0x91] sm:$0xff] }
  0x4f   :  { %1038 = vst.msk [vmem:[%s2223_s3 + $0x20] sm:$0xff] %vm28_vm0, %v1006_v21  ;;  %v975_v31 = vadd.f32 %v943_v23, %v649_v22  ;;  %v716_v35 = vmul.f32 %v1352_v53, %v1505_v18  ;;  %v781_v50 = vmul.f32 %v1362_v60, %v1507_v19  ;;  %v878_v36 = vmul.f32 %v1368_v3, %v1509_v20  ;;  %v1567_v14 = vld [vmem:[#allocation2 + $0x92] sm:$0xff] }
  0x50   :  { %v391_v54 = vadd.f32 %v359_v17, %v294_v30  ;;  %v553_v55 = vadd.f32 %v521_v34, %v456_v28  ;;  %v198_v38 = vmul.f32 %v1417_v61, %v1282_v25  ;;  %v263_v39 = vmul.f32 %v1419_v62, %v1299_v29 }
  0x51   :  { %v1007_v45 = vadd.f32 %v975_v31, %v909_v32  ;;  %v813_v46 = vadd.f32 %v781_v50, %v716_v35  ;;  %v360_v47 = vmul.f32 %v1422_v8, %v1316_v33  ;;  %v457_v48 = vmul.f32 %v1474_v51, %v1328_v37  ;;  %v1590_v50 = vld [vmem:[#allocation2 + $0x98] sm:$0xff] }
  0x52   :  { %v650_v57 = vadd.f32 %v618_v40, %v553_v55  ;;  %v944_v61 = vadd.f32 %v1339_v43, %v391_v54  ;;  %v295_v58 = vadd.f32 %v263_v39, %v198_v38  ;;  %v522_v62 = vmul.f32 %v1476_v52, %v1334_v42 }
  0x53   :  { %1039 = vst.msk [vmem:[%s2223_s3 + $0x28] sm:$0xff] %vm28_vm0, %v1007_v45  ;;  %v910_v59 = vadd.f32 %v878_v36, %v813_v46  ;;  %v619_v8 = vmul.f32 %v1482_v63, %v1345_v49  ;;  %v717_v1 = vmul.f32 %v1352_v53, %v1532_v41  ;;  %v782_v7 = vmul.f32 %v1362_v60, %v1534_v44  ;;  %v1592_v36 = vld [vmem:[#allocation2 + $0x99] sm:$0xff] }
  0x54   :  { %v976_v2 = vadd.f32 %v944_v61, %v650_v57  ;;  %v392_v12 = vadd.f32 %v360_v47, %v295_v58  ;;  %v554_v4 = vadd.f32 %v522_v62, %v457_v48  ;;  %v879_v13 = vmul.f32 %v1368_v3, %v1540_v56  ;;  %v1598_v45 = vld [vmem:[#allocation2 + $0x9a] sm:$0xff] }
  0x55   :  { %v814_v9 = vadd.f32 %v782_v7, %v717_v1  ;;  %v199_v10 = vmul.f32 %v1447_v24, %v1282_v25  ;;  %v264_v11 = vmul.f32 %v1449_v26, %v1299_v29  ;;  %v361_v0 = vmul.f32 %v1451_v27, %v1316_v33 }
  0x56   :  { %v1008_v15 = vadd.f32 %v976_v2, %v910_v59  ;;  %v651_v16 = vadd.f32 %v619_v8, %v554_v4  ;;  %v945_v17 = vadd.f32 %v1339_v43, %v392_v12  ;;  %v458_v21 = vmul.f32 %v1505_v18, %v1328_v37  ;;  %v1621_v4 = vld [vmem:[#allocation2 + $0xa8] sm:$0xff] }
  0x57   :  { %v911_v24 = vadd.f32 %v879_v13, %v814_v9  ;;  %v296_v22 = vadd.f32 %v264_v11, %v199_v10  ;;  %v523_v26 = vmul.f32 %v1507_v19, %v1334_v42  ;;  %v620_v27 = vmul.f32 %v1509_v20, %v1345_v49  ;;  %v1623_v13 = vld [vmem:[#allocation2 + $0xa9] sm:$0xff] }
  0x58   :  { %1040 = vst.msk [vmem:[%s2223_s3 + $0x30] sm:$0xff] %vm28_vm0, %v1008_v15  ;;  %v977_v23 = vadd.f32 %v945_v17, %v651_v16  ;;  %v718_v28 = vmul.f32 %v1352_v53, %v1563_v5  ;;  %v783_v32 = vmul.f32 %v1362_v60, %v1565_v6  ;;  %v880_v30 = vmul.f32 %v1368_v3, %v1567_v14  ;;  %v1625_v9 = vld [vmem:[#allocation2 + $0xaa] sm:$0xff] }
  0x59   :  { %v393_v34 = vadd.f32 %v361_v0, %v296_v22  ;;  %v555_v40 = vadd.f32 %v523_v26, %v458_v21  ;;  %v200_v31 = vmul.f32 %v1474_v51, %v1282_v25  ;;  %v265_v35 = vmul.f32 %v1476_v52, %v1299_v29 }
  0x5a   :  { %v1009_v54 = vadd.f32 %v977_v23, %v911_v24  ;;  %v815_v55 = vadd.f32 %v783_v32, %v718_v28  ;;  %v362_v38 = vmul.f32 %v1482_v63, %v1316_v33  ;;  %v459_v39 = vmul.f32 %v1532_v41, %v1328_v37  ;;  %v1648_v32 = vld [vmem:[#allocation2 + $0xb0] sm:$0xff] }
  0x5b   :  { %v652_v46 = vadd.f32 %v620_v27, %v555_v40  ;;  %v946_v51 = vadd.f32 %v1339_v43, %v393_v34  ;;  %v297_v47 = vadd.f32 %v265_v35, %v200_v31  ;;  %v524_v52 = vmul.f32 %v1534_v44, %v1334_v42 }
  0x5c   :  { %1041 = vst.msk [vmem:[%s2223_s3 + $0x38] sm:$0xff] %vm28_vm0, %v1009_v54  ;;  %v912_v48 = vadd.f32 %v880_v30, %v815_v55  ;;  %v621_v63 = vmul.f32 %v1540_v56, %v1345_v49  ;;  %v719_v57 = vmul.f32 %v1352_v53, %v1590_v50  ;;  %v784_v61 = vmul.f32 %v1362_v60, %v1592_v36  ;;  %v1650_v30 = vld [vmem:[#allocation2 + $0xb1] sm:$0xff] }
  0x5d   :  { %v978_v58 = vadd.f32 %v946_v51, %v652_v46  ;;  %v394_v62 = vadd.f32 %v362_v38, %v297_v47  ;;  %v556_v59 = vadd.f32 %v524_v52, %v459_v39  ;;  %v881_v8 = vmul.f32 %v1368_v3, %v1598_v45  ;;  %v1656_v54 = vld [vmem:[#allocation2 + $0xb2] sm:$0xff] }
  0x5e   :  { %v816_v1 = vadd.f32 %v784_v61, %v719_v57  ;;  %v201_v7 = vmul.f32 %v1505_v18, %v1282_v25  ;;  %v266_v2 = vmul.f32 %v1507_v19, %v1299_v29  ;;  %v363_v12 = vmul.f32 %v1509_v20, %v1316_v33 }
  0x5f   :  { %v1010_v10 = vadd.f32 %v978_v58, %v912_v48  ;;  %v653_v11 = vadd.f32 %v621_v63, %v556_v59  ;;  %v947_v0 = vadd.f32 %v1339_v43, %v394_v62  ;;  %v460_v15 = vmul.f32 %v1563_v5, %v1328_v37  ;;  %v1679_v59 = vld [vmem:[#allocation2 + $0xc0] sm:$0xff] }
  0x60   :  { %v913_v18 = vadd.f32 %v881_v8, %v816_v1  ;;  %v298_v16 = vadd.f32 %v266_v2, %v201_v7  ;;  %v525_v19 = vmul.f32 %v1565_v6, %v1334_v42  ;;  %v622_v20 = vmul.f32 %v1567_v14, %v1345_v49  ;;  %v1681_v8 = vld [vmem:[#allocation2 + $0xc1] sm:$0xff] }
  0x61   :  { %1042 = vst.msk [vmem:[%s2223_s3 + $0x40] sm:$0xff] %vm28_vm0, %v1010_v10  ;;  %v979_v17 = vadd.f32 %v947_v0, %v653_v11  ;;  %v720_v21 = vmul.f32 %v1352_v53, %v1621_v4  ;;  %v785_v24 = vmul.f32 %v1362_v60, %v1623_v13  ;;  %v882_v22 = vmul.f32 %v1368_v3, %v1625_v9  ;;  %v1683_v1 = vld [vmem:[#allocation2 + $0xc2] sm:$0xff] }
  0x62   :  { %v395_v26 = vadd.f32 %v363_v12, %v298_v16  ;;  %v557_v27 = vadd.f32 %v525_v19, %v460_v15  ;;  %v202_v23 = vmul.f32 %v1532_v41, %v1282_v25  ;;  %v267_v28 = vmul.f32 %v1534_v44, %v1299_v29 }
  0x63   :  { %v1011_v34 = vadd.f32 %v979_v17, %v913_v18  ;;  %v817_v40 = vadd.f32 %v785_v24, %v720_v21  ;;  %v364_v31 = vmul.f32 %v1540_v56, %v1316_v33  ;;  %v461_v35 = vmul.f32 %v1590_v50, %v1328_v37  ;;  %v1706_v24 = vld [vmem:[#allocation2 + $0xc8] sm:$0xff] }
  0x64   :  { %v654_v55 = vadd.f32 %v622_v20, %v557_v27  ;;  %v948_v41 = vadd.f32 %v1339_v43, %v395_v26  ;;  %v299_v38 = vadd.f32 %v267_v28, %v202_v23  ;;  %v526_v44 = vmul.f32 %v1592_v36, %v1334_v42 }
  0x65   :  { %1043 = vst.msk [vmem:[%s2223_s3 + $0x48] sm:$0xff] %vm28_vm0, %v1011_v34  ;;  %v914_v39 = vadd.f32 %v882_v22, %v817_v40  ;;  %v623_v56 = vmul.f32 %v1598_v45, %v1345_v49  ;;  %v721_v46 = vmul.f32 %v1352_v53, %v1648_v32  ;;  %v786_v51 = vmul.f32 %v1362_v60, %v1650_v30  ;;  %v1708_v22 = vld [vmem:[#allocation2 + $0xc9] sm:$0xff] }
  0x66   :  { %v980_v47 = vadd.f32 %v948_v41, %v654_v55  ;;  %v396_v52 = vadd.f32 %v364_v31, %v299_v38  ;;  %v558_v48 = vadd.f32 %v526_v44, %v461_v35  ;;  %v883_v63 = vmul.f32 %v1368_v3, %v1656_v54  ;;  %v1714_v34 = vld [vmem:[#allocation2 + $0xca] sm:$0xff] }
  0x67   :  { %v818_v57 = vadd.f32 %v786_v51, %v721_v46  ;;  %v203_v61 = vmul.f32 %v1563_v5, %v1282_v25  ;;  %v268_v58 = vmul.f32 %v1565_v6, %v1299_v29  ;;  %v365_v62 = vmul.f32 %v1567_v14, %v1316_v33 }
  0x68   :  { %v1012_v7 = vadd.f32 %v980_v47, %v914_v39  ;;  %v655_v2 = vadd.f32 %v623_v56, %v558_v48  ;;  %v949_v12 = vadd.f32 %v1339_v43, %v396_v52  ;;  %v462_v10 = vmul.f32 %v1621_v4, %v1328_v37  ;;  %v1737_v48 = vld [vmem:[#allocation2 + $0xd8] sm:$0xff] }
  0x69   :  { %v915_v5 = vadd.f32 %v883_v63, %v818_v57  ;;  %v300_v11 = vadd.f32 %v268_v58, %v203_v61  ;;  %v527_v6 = vmul.f32 %v1623_v13, %v1334_v42  ;;  %v624_v14 = vmul.f32 %v1625_v9, %v1345_v49  ;;  %v1739_v63 = vld [vmem:[#allocation2 + $0xd9] sm:$0xff] }
  0x6a   :  { %1044 = vst.msk [vmem:[%s2223_s3 + $0x50] sm:$0xff] %vm28_vm0, %v1012_v7  ;;  %v981_v0 = vadd.f32 %v949_v12, %v655_v2  ;;  %v722_v15 = vmul.f32 %v1352_v53, %v1679_v59  ;;  %v787_v18 = vmul.f32 %v1362_v60, %v1681_v8  ;;  %v884_v16 = vmul.f32 %v1368_v3, %v1683_v1  ;;  %v1741_v57 = vld [vmem:[#allocation2 + $0xda] sm:$0xff] }
  0x6b   :  { %v397_v19 = vadd.f32 %v365_v62, %v300_v11  ;;  %v559_v20 = vadd.f32 %v527_v6, %v462_v10  ;;  %v204_v17 = vmul.f32 %v1590_v50, %v1282_v25  ;;  %v269_v21 = vmul.f32 %v1592_v36, %v1299_v29 }
  0x6c   :  { %v1013_v26 = vadd.f32 %v981_v0, %v915_v5  ;;  %v819_v27 = vadd.f32 %v787_v18, %v722_v15  ;;  %v366_v23 = vmul.f32 %v1598_v45, %v1316_v33  ;;  %v463_v28 = vmul.f32 %v1648_v32, %v1328_v37  ;;  %v1764_v18 = vld [vmem:[#allocation2 + $0xe0] sm:$0xff] }
  0x6d   :  { %v656_v40 = vadd.f32 %v624_v14, %v559_v20  ;;  %v950_v50 = vadd.f32 %v1339_v43, %v397_v19  ;;  %v301_v31 = vadd.f32 %v269_v21, %v204_v17  ;;  %v528_v36 = vmul.f32 %v1650_v30, %v1334_v42 }
  0x6e   :  { %1045 = vst.msk [vmem:[%s2223_s3 + $0x58] sm:$0xff] %vm28_vm0, %v1013_v26  ;;  %v916_v35 = vadd.f32 %v884_v16, %v819_v27  ;;  %v625_v45 = vmul.f32 %v1656_v54, %v1345_v49  ;;  %v723_v55 = vmul.f32 %v1352_v53, %v1706_v24  ;;  %v788_v41 = vmul.f32 %v1362_v60, %v1708_v22  ;;  %v1766_v16 = vld [vmem:[#allocation2 + $0xe1] sm:$0xff] }
  0x6f   :  { %v982_v38 = vadd.f32 %v950_v50, %v656_v40  ;;  %v398_v44 = vadd.f32 %v366_v23, %v301_v31  ;;  %v560_v39 = vadd.f32 %v528_v36, %v463_v28  ;;  %v885_v56 = vmul.f32 %v1368_v3, %v1714_v34  ;;  %v1772_v26 = vld [vmem:[#allocation2 + $0xe2] sm:$0xff] }
  0x70   :  { %v820_v46 = vadd.f32 %v788_v41, %v723_v55  ;;  %v205_v51 = vmul.f32 %v1621_v4, %v1282_v25  ;;  %v270_v47 = vmul.f32 %v1623_v13, %v1299_v29  ;;  %v367_v52 = vmul.f32 %v1625_v9, %v1316_v33 }
  0x71   :  { %v1014_v61 = vadd.f32 %v982_v38, %v916_v35  ;;  %v657_v58 = vadd.f32 %v625_v45, %v560_v39  ;;  %v951_v62 = vadd.f32 %v1339_v43, %v398_v44  ;;  %v464_v7 = vmul.f32 %v1679_v59, %v1328_v37  ;;  %v1795_v39 = vld [vmem:[#allocation2 + $0xf0] sm:$0xff] }
  0x72   :  { %v917_v4 = vadd.f32 %v885_v56, %v820_v46  ;;  %v302_v2 = vadd.f32 %v270_v47, %v205_v51  ;;  %v529_v13 = vmul.f32 %v1681_v8, %v1334_v42  ;;  %v626_v9 = vmul.f32 %v1683_v1, %v1345_v49  ;;  %v1797_v56 = vld [vmem:[#allocation2 + $0xf1] sm:$0xff] }
  0x73   :  { %1046 = vst.msk [vmem:[%s2223_s3 + $0x60] sm:$0xff] %vm28_vm0, %v1014_v61  ;;  %v983_v12 = vadd.f32 %v951_v62, %v657_v58  ;;  %v724_v10 = vmul.f32 %v1352_v53, %v1737_v48  ;;  %v789_v5 = vmul.f32 %v1362_v60, %v1739_v63  ;;  %v886_v11 = vmul.f32 %v1368_v3, %v1741_v57  ;;  %v1799_v46 = vld [vmem:[#allocation2 + $0xf2] sm:$0xff] }
  0x74   :  { %v399_v6 = vadd.f32 %v367_v52, %v302_v2  ;;  %v561_v14 = vadd.f32 %v529_v13, %v464_v7  ;;  %v206_v0 = vmul.f32 %v1648_v32, %v1282_v25  ;;  %v271_v15 = vmul.f32 %v1650_v30, %v1299_v29 }
  0x75   :  { %v1015_v19 = vadd.f32 %v983_v12, %v917_v4  ;;  %v821_v20 = vadd.f32 %v789_v5, %v724_v10  ;;  %v368_v17 = vmul.f32 %v1656_v54, %v1316_v33  ;;  %v465_v21 = vmul.f32 %v1706_v24, %v1328_v37  ;;  %v1822_v5 = vld [vmem:[#allocation2 + $0xf8] sm:$0xff] }
  0x76   :  { %v658_v27 = vadd.f32 %v626_v9, %v561_v14  ;;  %v952_v32 = vadd.f32 %v1339_v43, %v399_v6  ;;  %v303_v23 = vadd.f32 %v271_v15, %v206_v0  ;;  %v530_v30 = vmul.f32 %v1708_v22, %v1334_v42 }
  0x77   :  { %1047 = vst.msk [vmem:[%s2223_s3 + $0x68] sm:$0xff] %vm28_vm0, %v1015_v19  ;;  %v918_v28 = vadd.f32 %v886_v11, %v821_v20  ;;  %v627_v54 = vmul.f32 %v1714_v34, %v1345_v49  ;;  %v725_v40 = vmul.f32 %v1352_v53, %v1764_v18  ;;  %v790_v50 = vmul.f32 %v1362_v60, %v1766_v16  ;;  %v1824_v11 = vld [vmem:[#allocation2 + $0xf9] sm:$0xff] }
  0x78   :  { %v984_v31 = vadd.f32 %v952_v32, %v658_v27  ;;  %v400_v36 = vadd.f32 %v368_v17, %v303_v23  ;;  %v562_v35 = vadd.f32 %v530_v30, %v465_v21  ;;  %v887_v45 = vmul.f32 %v1368_v3, %v1772_v26  ;;  %v1830_v19 = vld [vmem:[#allocation2 + $0xfa] sm:$0xff] }
  0x79   :  { %v822_v55 = vadd.f32 %v790_v50, %v725_v40  ;;  %v207_v41 = vmul.f32 %v1679_v59, %v1282_v25  ;;  %v272_v38 = vmul.f32 %v1681_v8, %v1299_v29  ;;  %v369_v44 = vmul.f32 %v1683_v1, %v1316_v33 }
  0x7a   :  { %v1016_v51 = vadd.f32 %v984_v31, %v918_v28  ;;  %v659_v47 = vadd.f32 %v627_v54, %v562_v35  ;;  %v953_v52 = vadd.f32 %v1339_v43, %v400_v36  ;;  %v466_v61 = vmul.f32 %v1737_v48, %v1328_v37  ;;  %v1853_v35 = vld [vmem:[#allocation2 + $0x108] sm:$0xff] }
  0x7b   :  { %v919_v59 = vadd.f32 %v887_v45, %v822_v55  ;;  %v304_v58 = vadd.f32 %v272_v38, %v207_v41  ;;  %v531_v8 = vmul.f32 %v1739_v63, %v1334_v42  ;;  %v628_v1 = vmul.f32 %v1741_v57, %v1345_v49  ;;  %v1855_v45 = vld [vmem:[#allocation2 + $0x109] sm:$0xff] }
  0x7c   :  { %1048 = vst.msk [vmem:[%s2223_s3 + $0x70] sm:$0xff] %vm28_vm0, %v1016_v51  ;;  %v985_v62 = vadd.f32 %v953_v52, %v659_v47  ;;  %v726_v7 = vmul.f32 %v1352_v53, %v1795_v39  ;;  %v791_v4 = vmul.f32 %v1362_v60, %v1797_v56  ;;  %v888_v2 = vmul.f32 %v1368_v3, %v1799_v46  ;;  %v1857_v55 = vld [vmem:[#allocation2 + $0x10a] sm:$0xff] }
  0x7d   :  { %v401_v13 = vadd.f32 %v369_v44, %v304_v58  ;;  %v563_v9 = vadd.f32 %v531_v8, %v466_v61  ;;  %v208_v12 = vmul.f32 %v1706_v24, %v1282_v25  ;;  %v273_v10 = vmul.f32 %v1708_v22, %v1299_v29 }
  0x7e   :  { %v1017_v6 = vadd.f32 %v985_v62, %v919_v59  ;;  %v823_v14 = vadd.f32 %v791_v4, %v726_v7  ;;  %v370_v0 = vmul.f32 %v1714_v34, %v1316_v33  ;;  %v467_v15 = vmul.f32 %v1764_v18, %v1328_v37  ;;  %v1880_v4 = vld [vmem:[#allocation2 + $0x110] sm:$0xff] }
  0x7f   :  { %v660_v20 = vadd.f32 %v628_v1, %v563_v9  ;;  %v954_v24 = vadd.f32 %v1339_v43, %v401_v13  ;;  %v305_v17 = vadd.f32 %v273_v10, %v208_v12  ;;  %v532_v22 = vmul.f32 %v1766_v16, %v1334_v42 }
  0x80   :  { %1049 = vst.msk [vmem:[%s2223_s3 + $0x78] sm:$0xff] %vm28_vm0, %v1017_v6  ;;  %v920_v21 = vadd.f32 %v888_v2, %v823_v14  ;;  %v629_v34 = vmul.f32 %v1772_v26, %v1345_v49  ;;  %v727_v27 = vmul.f32 %v1352_v53, %v1822_v5  ;;  %v792_v32 = vmul.f32 %v1362_v60, %v1824_v11  ;;  %v1882_v2 = vld [vmem:[#allocation2 + $0x111] sm:$0xff] }
  0x81   :  { %v986_v23 = vadd.f32 %v954_v24, %v660_v20  ;;  %v402_v30 = vadd.f32 %v370_v0, %v305_v17  ;;  %v564_v28 = vadd.f32 %v532_v22, %v467_v15  ;;  %v889_v54 = vmul.f32 %v1368_v3, %v1830_v19  ;;  %v1888_v6 = vld [vmem:[#allocation2 + $0x112] sm:$0xff] }
  0x82   :  { %v824_v40 = vadd.f32 %v792_v32, %v727_v27  ;;  %v209_v50 = vmul.f32 %v1737_v48, %v1282_v25  ;;  %v274_v31 = vmul.f32 %v1739_v63, %v1299_v29  ;;  %v371_v36 = vmul.f32 %v1741_v57, %v1316_v33 }
  0x83   :  { %v1018_v41 = vadd.f32 %v986_v23, %v920_v21  ;;  %v661_v38 = vadd.f32 %v629_v34, %v564_v28  ;;  %v955_v44 = vadd.f32 %v1339_v43, %v402_v30  ;;  %v468_v51 = vmul.f32 %v1795_v39, %v1328_v37  ;;  %v1911_v28 = vld [vmem:[#allocation2 + $0x120] sm:$0xff] }
  0x84   :  { %v921_v48 = vadd.f32 %v889_v54, %v824_v40  ;;  %v306_v47 = vadd.f32 %v274_v31, %v209_v50  ;;  %v533_v63 = vmul.f32 %v1797_v56, %v1334_v42  ;;  %v630_v57 = vmul.f32 %v1799_v46, %v1345_v49  ;;  %v1913_v54 = vld [vmem:[#allocation2 + $0x121] sm:$0xff] }
  0x85   :  { %1050 = vst.msk [vmem:[%s2223_s3 + $0x80] sm:$0xff] %vm28_vm0, %v1018_v41  ;;  %v987_v52 = vadd.f32 %v955_v44, %v661_v38  ;;  %v728_v61 = vmul.f32 %v1352_v53, %v1853_v35  ;;  %v793_v59 = vmul.f32 %v1362_v60, %v1855_v45  ;;  %v890_v58 = vmul.f32 %v1368_v3, %v1857_v55  ;;  %v1915_v40 = vld [vmem:[#allocation2 + $0x122] sm:$0xff] }
  0x86   :  { %v403_v8 = vadd.f32 %v371_v36, %v306_v47  ;;  %v565_v1 = vadd.f32 %v533_v63, %v468_v51  ;;  %v210_v62 = vmul.f32 %v1764_v18, %v1282_v25  ;;  %v275_v7 = vmul.f32 %v1766_v16, %v1299_v29 }
  0x87   :  { %v1019_v13 = vadd.f32 %v987_v52, %v921_v48  ;;  %v825_v9 = vadd.f32 %v793_v59, %v728_v61  ;;  %v372_v12 = vmul.f32 %v1772_v26, %v1316_v33  ;;  %v469_v10 = vmul.f32 %v1822_v5, %v1328_v37  ;;  %v1938_v59 = vld [vmem:[#allocation2 + $0x128] sm:$0xff] }
  0x88   :  { %v662_v14 = vadd.f32 %v630_v57, %v565_v1  ;;  %v956_v18 = vadd.f32 %v1339_v43, %v403_v8  ;;  %v307_v0 = vadd.f32 %v275_v7, %v210_v62  ;;  %v534_v16 = vmul.f32 %v1824_v11, %v1334_v42 }
  0x89   :  { %1051 = vst.msk [vmem:[%s2223_s3 + $0x88] sm:$0xff] %vm28_vm0, %v1019_v13  ;;  %v922_v15 = vadd.f32 %v890_v58, %v825_v9  ;;  %v631_v26 = vmul.f32 %v1830_v19, %v1345_v49  ;;  %v729_v20 = vmul.f32 %v1352_v53, %v1880_v4  ;;  %v794_v24 = vmul.f32 %v1362_v60, %v1882_v2  ;;  %v1940_v58 = vld [vmem:[#allocation2 + $0x129] sm:$0xff] }
  0x8a   :  { %v988_v17 = vadd.f32 %v956_v18, %v662_v14  ;;  %v404_v22 = vadd.f32 %v372_v12, %v307_v0  ;;  %v566_v21 = vadd.f32 %v534_v16, %v469_v10  ;;  %v891_v34 = vmul.f32 %v1368_v3, %v1888_v6  ;;  %v1946_v13 = vld [vmem:[#allocation2 + $0x12a] sm:$0xff] }
  0x8b   :  { %v826_v27 = vadd.f32 %v794_v24, %v729_v20  ;;  %v211_v32 = vmul.f32 %v1795_v39, %v1282_v25  ;;  %v276_v23 = vmul.f32 %v1797_v56, %v1299_v29  ;;  %v373_v30 = vmul.f32 %v1799_v46, %v1316_v33 }
  0x8c   :  { %v1020_v50 = vadd.f32 %v988_v17, %v922_v15  ;;  %v663_v31 = vadd.f32 %v631_v26, %v566_v21  ;;  %v957_v36 = vadd.f32 %v1339_v43, %v404_v22  ;;  %v470_v41 = vmul.f32 %v1853_v35, %v1328_v37  ;;  %v1969_v21 = vld [vmem:[#allocation2 + $0x138] sm:$0xff] }
  0x8d   :  { %v923_v39 = vadd.f32 %v891_v34, %v826_v27  ;;  %v308_v38 = vadd.f32 %v276_v23, %v211_v32  ;;  %v535_v56 = vmul.f32 %v1855_v45, %v1334_v42  ;;  %v632_v46 = vmul.f32 %v1857_v55, %v1345_v49  ;;  %v1971_v34 = vld [vmem:[#allocation2 + $0x139] sm:$0xff] }
  0x8e   :  { %1052 = vst.msk [vmem:[%s2223_s3 + $0x90] sm:$0xff] %vm28_vm0, %v1020_v50  ;;  %v989_v44 = vadd.f32 %v957_v36, %v663_v31  ;;  %v730_v51 = vmul.f32 %v1352_v53, %v1911_v28  ;;  %v795_v48 = vmul.f32 %v1362_v60, %v1913_v54  ;;  %v892_v47 = vmul.f32 %v1368_v3, %v1915_v40  ;;  %v1973_v27 = vld [vmem:[#allocation2 + $0x13a] sm:$0xff] }
  0x8f   :  { %v405_v63 = vadd.f32 %v373_v30, %v308_v38  ;;  %v567_v57 = vadd.f32 %v535_v56, %v470_v41  ;;  %v212_v52 = vmul.f32 %v1822_v5, %v1282_v25  ;;  %v277_v61 = vmul.f32 %v1824_v11, %v1299_v29 }
  0x90   :  { %v1021_v8 = vadd.f32 %v989_v44, %v923_v39  ;;  %v827_v1 = vadd.f32 %v795_v48, %v730_v51  ;;  %v374_v62 = vmul.f32 %v1830_v19, %v1316_v33  ;;  %v471_v7 = vmul.f32 %v1880_v4, %v1328_v37  ;;  %v1996_v48 = vld [vmem:[#allocation2 + $0x140] sm:$0xff] }
  0x91   :  { %v664_v9 = vadd.f32 %v632_v46, %v567_v57  ;;  %v958_v5 = vadd.f32 %v1339_v43, %v405_v63  ;;  %v309_v12 = vadd.f32 %v277_v61, %v212_v52  ;;  %v536_v11 = vmul.f32 %v1882_v2, %v1334_v42 }
  0x92   :  { %1053 = vst.msk [vmem:[%s2223_s3 + $0x98] sm:$0xff] %vm28_vm0, %v1021_v8  ;;  %v924_v10 = vadd.f32 %v892_v47, %v827_v1  ;;  %v633_v19 = vmul.f32 %v1888_v6, %v1345_v49  ;;  %v731_v14 = vmul.f32 %v1352_v53, %v1938_v59  ;;  %v796_v18 = vmul.f32 %v1362_v60, %v1940_v58  ;;  %v1998_v47 = vld [vmem:[#allocation2 + $0x141] sm:$0xff] }
  0x93   :  { %v990_v0 = vadd.f32 %v958_v5, %v664_v9  ;;  %v406_v16 = vadd.f32 %v374_v62, %v309_v12  ;;  %v568_v15 = vadd.f32 %v536_v11, %v471_v7  ;;  %v893_v26 = vmul.f32 %v1368_v3, %v1946_v13  ;;  %v2004_v8 = vld [vmem:[#allocation2 + $0x142] sm:$0xff] }
  0x94   :  { %v828_v20 = vadd.f32 %v796_v18, %v731_v14  ;;  %v213_v24 = vmul.f32 %v1853_v35, %v1282_v25  ;;  %v278_v17 = vmul.f32 %v1855_v45, %v1299_v29  ;;  %v375_v22 = vmul.f32 %v1857_v55, %v1316_v33 }
  0x95   :  { %v1022_v32 = vadd.f32 %v990_v0, %v924_v10  ;;  %v665_v23 = vadd.f32 %v633_v19, %v568_v15  ;;  %v959_v30 = vadd.f32 %v1339_v43, %v406_v16  ;;  %v472_v50 = vmul.f32 %v1911_v28, %v1328_v37  ;;  %v2027_v15 = vld [vmem:[#allocation2 + $0x150] sm:$0xff] }
  0x96   :  { %v925_v35 = vadd.f32 %v893_v26, %v828_v20  ;;  %v310_v31 = vadd.f32 %v278_v17, %v213_v24  ;;  %v537_v45 = vmul.f32 %v1913_v54, %v1334_v42  ;;  %v634_v55 = vmul.f32 %v1915_v40, %v1345_v49  ;;  %v2029_v26 = vld [vmem:[#allocation2 + $0x151] sm:$0xff] }
  0x97   :  { %1054 = vst.msk [vmem:[%s2223_s3 + $0xa0] sm:$0xff] %vm28_vm0, %v1022_v32  ;;  %v991_v36 = vadd.f32 %v959_v30, %v665_v23  ;;  %v732_v41 = vmul.f32 %v1352_v53, %v1969_v21  ;;  %v797_v39 = vmul.f32 %v1362_v60, %v1971_v34  ;;  %v894_v38 = vmul.f32 %v1368_v3, %v1973_v27  ;;  %v2031_v20 = vld [vmem:[#allocation2 + $0x152] sm:$0xff] }
  0x98   :  { %v407_v56 = vadd.f32 %v375_v22, %v310_v31  ;;  %v569_v46 = vadd.f32 %v537_v45, %v472_v50  ;;  %v214_v44 = vmul.f32 %v1880_v4, %v1282_v25  ;;  %v279_v51 = vmul.f32 %v1882_v2, %v1299_v29 }
  0x99   :  { %v1023_v63 = vadd.f32 %v991_v36, %v925_v35  ;;  %v829_v57 = vadd.f32 %v797_v39, %v732_v41  ;;  %v376_v52 = vmul.f32 %v1888_v6, %v1316_v33  ;;  %v473_v61 = vmul.f32 %v1938_v59, %v1328_v37  ;;  %v2054_v39 = vld [vmem:[#allocation2 + $0x158] sm:$0xff] }
  0x9a   :  { %v666_v1 = vadd.f32 %v634_v55, %v569_v46  ;;  %v960_v4 = vadd.f32 %v1339_v43, %v407_v56  ;;  %v311_v62 = vadd.f32 %v279_v51, %v214_v44  ;;  %v538_v2 = vmul.f32 %v1940_v58, %v1334_v42 }
  0x9b   :  { %1055 = vst.msk [vmem:[%s2223_s3 + $0xa8] sm:$0xff] %vm28_vm0, %v1023_v63  ;;  %v926_v7 = vadd.f32 %v894_v38, %v829_v57  ;;  %v635_v6 = vmul.f32 %v1946_v13, %v1345_v49  ;;  %v733_v9 = vmul.f32 %v1352_v53, %v1996_v48  ;;  %v798_v5 = vmul.f32 %v1362_v60, %v1998_v47  ;;  %v2056_v38 = vld [vmem:[#allocation2 + $0x159] sm:$0xff] }
  0x9c   :  { %v992_v12 = vadd.f32 %v960_v4, %v666_v1  ;;  %v408_v11 = vadd.f32 %v376_v52, %v311_v62  ;;  %v570_v10 = vadd.f32 %v538_v2, %v473_v61  ;;  %v895_v19 = vmul.f32 %v1368_v3, %v2004_v8  ;;  %v2062_v63 = vld [vmem:[#allocation2 + $0x15a] sm:$0xff] }
  0x9d   :  { %v830_v14 = vadd.f32 %v798_v5, %v733_v9  ;;  %v215_v18 = vmul.f32 %v1911_v28, %v1282_v25  ;;  %v280_v0 = vmul.f32 %v1913_v54, %v1299_v29  ;;  %v377_v16 = vmul.f32 %v1915_v40, %v1316_v33 }
  0x9e   :  { %v1024_v24 = vadd.f32 %v992_v12, %v926_v7  ;;  %v667_v17 = vadd.f32 %v635_v6, %v570_v10  ;;  %v961_v22 = vadd.f32 %v1339_v43, %v408_v11  ;;  %v474_v32 = vmul.f32 %v1969_v21, %v1328_v37  ;;  %v2085_v10 = vld [vmem:[#allocation2 + $0x168] sm:$0xff] }
  0x9f   :  { %v927_v28 = vadd.f32 %v895_v19, %v830_v14  ;;  %v312_v23 = vadd.f32 %v280_v0, %v215_v18  ;;  %v539_v54 = vmul.f32 %v1971_v34, %v1334_v42  ;;  %v636_v40 = vmul.f32 %v1973_v27, %v1345_v49  ;;  %v2087_v19 = vld [vmem:[#allocation2 + $0x169] sm:$0xff] }
  0xa0   :  { %1056 = vst.msk [vmem:[%s2223_s3 + $0xb0] sm:$0xff] %vm28_vm0, %v1024_v24  ;;  %v993_v30 = vadd.f32 %v961_v22, %v667_v17  ;;  %v734_v50 = vmul.f32 %v1352_v53, %v2027_v15  ;;  %v799_v35 = vmul.f32 %v1362_v60, %v2029_v26  ;;  %v896_v31 = vmul.f32 %v1368_v3, %v2031_v20  ;;  %v2089_v14 = vld [vmem:[#allocation2 + $0x16a] sm:$0xff] }
  0xa1   :  { %v409_v45 = vadd.f32 %v377_v16, %v312_v23  ;;  %v571_v55 = vadd.f32 %v539_v54, %v474_v32  ;;  %v216_v36 = vmul.f32 %v1938_v59, %v1282_v25  ;;  %v281_v41 = vmul.f32 %v1940_v58, %v1299_v29 }
  0xa2   :  { %v1025_v56 = vadd.f32 %v993_v30, %v927_v28  ;;  %v831_v46 = vadd.f32 %v799_v35, %v734_v50  ;;  %v378_v44 = vmul.f32 %v1946_v13, %v1316_v33  ;;  %v475_v51 = vmul.f32 %v1996_v48, %v1328_v37  ;;  %v2112_v35 = vld [vmem:[#allocation2 + $0x170] sm:$0xff] }
  0xa3   :  { %v668_v57 = vadd.f32 %v636_v40, %v571_v55  ;;  %v962_v59 = vadd.f32 %v1339_v43, %v409_v45  ;;  %v313_v52 = vadd.f32 %v281_v41, %v216_v36  ;;  %v540_v58 = vmul.f32 %v1998_v47, %v1334_v42 }
  0xa4   :  { %1057 = vst.msk [vmem:[%s2223_s3 + $0xb8] sm:$0xff] %vm28_vm0, %v1025_v56  ;;  %v928_v61 = vadd.f32 %v896_v31, %v831_v46  ;;  %v637_v13 = vmul.f32 %v2004_v8, %v1345_v49  ;;  %v735_v1 = vmul.f32 %v1352_v53, %v2054_v39  ;;  %v800_v4 = vmul.f32 %v1362_v60, %v2056_v38  ;;  %v2114_v31 = vld [vmem:[#allocation2 + $0x171] sm:$0xff] }
  0xa5   :  { %v994_v62 = vadd.f32 %v962_v59, %v668_v57  ;;  %v410_v2 = vadd.f32 %v378_v44, %v313_v52  ;;  %v572_v7 = vadd.f32 %v540_v58, %v475_v51  ;;  %v897_v6 = vmul.f32 %v1368_v3, %v2062_v63  ;;  %v2120_v56 = vld [vmem:[#allocation2 + $0x172] sm:$0xff] }
  0xa6   :  { %v832_v9 = vadd.f32 %v800_v4, %v735_v1  ;;  %v217_v5 = vmul.f32 %v1969_v21, %v1282_v25  ;;  %v282_v12 = vmul.f32 %v1971_v34, %v1299_v29  ;;  %v379_v11 = vmul.f32 %v1973_v27, %v1316_v33 }
  0xa7   :  { %v1026_v18 = vadd.f32 %v994_v62, %v928_v61  ;;  %v669_v0 = vadd.f32 %v637_v13, %v572_v7  ;;  %v963_v16 = vadd.f32 %v1339_v43, %v410_v2  ;;  %v476_v24 = vmul.f32 %v2027_v15, %v1328_v37  ;;  %v705_v7 = vld [vmem:[#allocation2 + $0x180] sm:$0xff] }
  0xa8   :  { %v929_v21 = vadd.f32 %v897_v6, %v832_v9  ;;  %v314_v17 = vadd.f32 %v282_v12, %v217_v5  ;;  %v541_v34 = vmul.f32 %v2029_v26, %v1334_v42  ;;  %v638_v27 = vmul.f32 %v2031_v20, %v1345_v49  ;;  %v770_v6 = vld [vmem:[#allocation2 + $0x181] sm:$0xff] }
  0xa9   :  { %1058 = vst.msk [vmem:[%s2223_s3 + $0xc0] sm:$0xff] %vm28_vm0, %v1026_v18  ;;  %v995_v22 = vadd.f32 %v963_v16, %v669_v0  ;;  %v736_v32 = vmul.f32 %v1352_v53, %v2085_v10  ;;  %v801_v28 = vmul.f32 %v1362_v60, %v2087_v19  ;;  %v898_v23 = vmul.f32 %v1368_v3, %v2089_v14  ;;  %v867_v9 = vld [vmem:[#allocation2 + $0x182] sm:$0xff] }
  0xaa   :  { %v411_v54 = vadd.f32 %v379_v11, %v314_v17  ;;  %v573_v40 = vadd.f32 %v541_v34, %v476_v24  ;;  %v218_v30 = vmul.f32 %v1996_v48, %v1282_v25  ;;  %v283_v50 = vmul.f32 %v1998_v47, %v1299_v29 }
  0xab   :  { %v1027_v45 = vadd.f32 %v995_v22, %v929_v21  ;;  %v833_v55 = vadd.f32 %v801_v28, %v736_v32  ;;  %v380_v36 = vmul.f32 %v2004_v8, %v1316_v33  ;;  %v477_v41 = vmul.f32 %v2054_v39, %v1328_v37  ;;  %v706_v28 = vld [vmem:[#allocation2 + $0x188] sm:$0xff] }
  0xac   :  { %v670_v46 = vadd.f32 %v638_v27, %v573_v40  ;;  %v964_v48 = vadd.f32 %v1339_v43, %v411_v54  ;;  %v315_v44 = vadd.f32 %v283_v50, %v218_v30  ;;  %v542_v47 = vmul.f32 %v2056_v38, %v1334_v42 }
  0xad   :  { %1059 = vst.msk [vmem:[%s2223_s3 + $0xc8] sm:$0xff] %vm28_vm0, %v1027_v45  ;;  %v930_v51 = vadd.f32 %v898_v23, %v833_v55  ;;  %v639_v8 = vmul.f32 %v2062_v63, %v1345_v49  ;;  %v737_v57 = vmul.f32 %v1352_v53, %v2112_v35  ;;  %v802_v59 = vmul.f32 %v1362_v60, %v2114_v31  ;;  %v771_v23 = vld [vmem:[#allocation2 + $0x189] sm:$0xff] }
  0xae   :  { %v996_v52 = vadd.f32 %v964_v48, %v670_v46  ;;  %v412_v58 = vadd.f32 %v380_v36, %v315_v44  ;;  %v574_v61 = vadd.f32 %v542_v47, %v477_v41  ;;  %v899_v13 = vmul.f32 %v1368_v3, %v2120_v56  ;;  %v868_v45 = vld [vmem:[#allocation2 + $0x18a] sm:$0xff] }
  0xaf   :  { %v834_v1 = vadd.f32 %v802_v59, %v737_v57  ;;  %v219_v4 = vmul.f32 %v2027_v15, %v1282_v25  ;;  %v284_v62 = vmul.f32 %v2029_v26, %v1299_v29  ;;  %v381_v2 = vmul.f32 %v2031_v20, %v1316_v33 }
  0xb0   :  { %v1028_v5 = vadd.f32 %v996_v52, %v930_v51  ;;  %v671_v12 = vadd.f32 %v639_v8, %v574_v61  ;;  %v965_v11 = vadd.f32 %v1339_v43, %v412_v58  ;;  %v478_v18 = vmul.f32 %v2085_v10, %v1328_v37  ;;  %v707_v61 = vld [vmem:[#allocation2 + $0x198] sm:$0xff] }
  0xb1   :  { %v931_v0 = vadd.f32 %v899_v13, %v834_v1  ;;  %v316_v16 = vadd.f32 %v284_v62, %v219_v4  ;;  %v543_v15 = vmul.f32 %v2087_v19, %v1334_v42  ;;  %v640_v26 = vmul.f32 %v2089_v14, %v1345_v49  ;;  %v772_v13 = vld [vmem:[#allocation2 + $0x199] sm:$0xff] }
  0xb2   :  { %1060 = vst.msk [vmem:[%s2223_s3 + $0xd0] sm:$0xff] %vm28_vm0, %v1028_v5  ;;  %v997_v20 = vadd.f32 %v965_v11, %v671_v12  ;;  %v738_v24 = vmul.f32 %v1352_v53, %v705_v7  ;;  %v803_v21 = vmul.f32 %v1362_v60, %v770_v6  ;;  %v900_v17 = vmul.f32 %v1368_v3, %v867_v9  ;;  %v869_v1 = vld [vmem:[#allocation2 + $0x19a] sm:$0xff] }
  0xb3   :  { %v413_v34 = vadd.f32 %v381_v2, %v316_v16  ;;  %v575_v27 = vadd.f32 %v543_v15, %v478_v18  ;;  %v220_v22 = vmul.f32 %v2054_v39, %v1282_v25  ;;  %v285_v32 = vmul.f32 %v2056_v38, %v1299_v29 }
  0xb4   :  { %v1029_v54 = vadd.f32 %v997_v20, %v931_v0  ;;  %v835_v40 = vadd.f32 %v803_v21, %v738_v24  ;;  %v382_v30 = vmul.f32 %v2062_v63, %v1316_v33  ;;  %v479_v50 = vmul.f32 %v2112_v35, %v1328_v37  ;;  %v773_v20 = vld [vmem:[#allocation2 + $0x1a1] sm:$0xff] }
  0xb5   :  { %v672_v55 = vadd.f32 %v640_v26, %v575_v27  ;;  %v966_v36 = vadd.f32 %v1339_v43, %v413_v34  ;;  %v317_v41 = vadd.f32 %v285_v32, %v220_v22  ;;  %v544_v39 = vmul.f32 %v2114_v31, %v1334_v42  ;;  %v870_v27 = vld [vmem:[#allocation2 + $0x1a2] sm:$0xff] }
  0xb6   :  { %1061 = vst.msk [vmem:[%s2223_s3 + $0xd8] sm:$0xff] %vm28_vm0, %v1029_v54  ;;  %v932_v38 = vadd.f32 %v900_v17, %v835_v40  ;;  %v641_v63 = vmul.f32 %v2120_v56, %v1345_v49  ;;  %v739_v46 = vmul.f32 %v1352_v53, %v706_v28  ;;  %v804_v48 = vmul.f32 %v1362_v60, %v771_v23 }
  0xb7   :  { %v998_v44 = vadd.f32 %v966_v36, %v672_v55  ;;  %v414_v47 = vadd.f32 %v382_v30, %v317_v41  ;;  %v576_v51 = vadd.f32 %v544_v39, %v479_v50  ;;  %v901_v8 = vmul.f32 %v1368_v3, %v868_v45 }
  0xb8   :  { %v836_v57 = vadd.f32 %v804_v48, %v739_v46  ;;  %v221_v59 = vmul.f32 %v2085_v10, %v1282_v25  ;;  %v286_v52 = vmul.f32 %v2087_v19, %v1299_v29  ;;  %v383_v58 = vmul.f32 %v2089_v14, %v1316_v33 }
  0xb9   :  { %v1030_v4 = vadd.f32 %v998_v44, %v932_v38  ;;  %v673_v62 = vadd.f32 %v641_v63, %v576_v51  ;;  %v967_v2 = vadd.f32 %v1339_v43, %v414_v47  ;;  %v480_v5 = vmul.f32 %v705_v7, %v1328_v37 }
  0xba   :  { %v933_v12 = vadd.f32 %v901_v8, %v836_v57  ;;  %v318_v11 = vadd.f32 %v286_v52, %v221_v59  ;;  %v545_v18 = vmul.f32 %v770_v6, %v1334_v42  ;;  %v642_v10 = vmul.f32 %v867_v9, %v1345_v49  ;;  %v708_v9 = vld [vmem:[#allocation2 + $0x1a0] sm:$0xff] }
  0xbb   :  { %1062 = vst.msk [vmem:[%s2223_s3 + $0xe0] sm:$0xff] %vm28_vm0, %v1030_v4  ;;  %v999_v19 = vadd.f32 %v967_v2, %v673_v62  ;;  %v740_v14 = vmul.f32 %v1352_v53, %v707_v61  ;;  %v805_v0 = vmul.f32 %v1362_v60, %v772_v13  ;;  %v902_v16 = vmul.f32 %v1368_v3, %v869_v1 }
  0xbc   :  { %v415_v15 = vadd.f32 %v383_v58, %v318_v11  ;;  %v577_v7 = vadd.f32 %v545_v18, %v480_v5  ;;  %v222_v26 = vmul.f32 %v2112_v35, %v1282_v25  ;;  %v287_v6 = vmul.f32 %v2114_v31, %v1299_v29 }
  0xbd   :  { %v1031_v24 = vadd.f32 %v999_v19, %v933_v12  ;;  %v837_v21 = vadd.f32 %v805_v0, %v740_v14  ;;  %v384_v17 = vmul.f32 %v2120_v56, %v1316_v33  ;;  %v481_v34 = vmul.f32 %v706_v28, %v1328_v37 }
  0xbe   :  { %v674_v22 = vadd.f32 %v642_v10, %v577_v7  ;;  %v968_v32 = vadd.f32 %v1339_v43, %v415_v15  ;;  %v319_v54 = vadd.f32 %v287_v6, %v222_v26  ;;  %v546_v40 = vmul.f32 %v771_v23, %v1334_v42 }
  0xbf   :  { %1063 = vst.msk [vmem:[%s2223_s3 + $0xe8] sm:$0xff] %vm28_vm0, %v1031_v24  ;;  %v934_v25 = vadd.f32 %v902_v16, %v837_v21  ;;  %v643_v29 = vmul.f32 %v868_v45, %v1345_v49  ;;  %v741_v35 = vmul.f32 %v1352_v53, %v708_v9  ;;  %v806_v33 = vmul.f32 %v1362_v60, %v773_v20 }
  0xc0   :  { %v1000_v37 = vadd.f32 %v968_v32, %v674_v22  ;;  %v416_v31 = vadd.f32 %v384_v17, %v319_v54  ;;  %v578_v56 = vadd.f32 %v546_v40, %v481_v34  ;;  %v903_v28 = vmul.f32 %v1368_v3, %v870_v27 }
  0xc1   :  { %v838_v30 = vadd.f32 %v806_v33, %v741_v35 }
  0xc2   :  { %v1032_v50 = vadd.f32 %v1000_v37, %v934_v25  ;;  %v675_v42 = vadd.f32 %v643_v29, %v578_v56  ;;  %v969_v23 = vadd.f32 %v1339_v43, %v416_v31 }
  0xc3   :  { %v935_v49 = vadd.f32 %v903_v28, %v838_v30 }
  0xc4   :  { %1064 = vst.msk [vmem:[%s2223_s3 + $0xf0] sm:$0xff] %vm28_vm0, %v1032_v50  ;;  %v1001_v45 = vadd.f32 %v969_v23, %v675_v42 }
  0xc6   :  { %v1033_v53 = vadd.f32 %v1001_v45, %v935_v49 }
  0xc8   :  { %1065 = vst.msk [vmem:[%s2223_s3 + $0xf8] sm:$0xff] %vm28_vm0, %v1033_v53 }
  0xc9   :  { %1070 = vsyncpa [#allocation5], 1 }

</bundles_post_ra>
